<compile_context>
chip_gen: v7x
topology: tpu7x:2x2x1
jax: 0.10.0
libtpu: 0.0.40
codegen_flags: <defaults>
</compile_context>

<pallas_src>
import jax
import jax.numpy as jnp
from jax.experimental import pallas as pl
from jax.experimental.pallas import tpu as pltpu


# ----------------------------------------------------------------------------
# Fused kernel: layer-0 fwd+bwd (interleaved) + layer-1 bwd + fc, all in VMEM.
# ----------------------------------------------------------------------------
def bilstm_fused_kernel(x_ref,                      # (T*B, D)  time-major flattened
                        w0x_ref, b0_ref,            # layer0 ih, fwd|bwd concat: (D,8H),(1,8H)
                        w0f_h_ref, w0b_h_ref,       # layer0 hh: (H,4H) each
                        w1_x_ref, w1_h_ref, b1_ref, # layer1 bwd: (2H,4H),(H,4H),(1,4H)
                        fcw_ref, fcb_ref,           # (H,O),(1,O)
                        out_ref,                    # (B,O)
                        seq_ref):                   # VMEM scratch (T*B, 2H): [out_fwd | out_bwd]
    B, O = out_ref.shape
    TB, D = x_ref.shape
    T = TB // B
    H = w0f_h_ref.shape[0]
    G = 4 * H
    f32 = jnp.float32

    # ---- hoisted weight loads (stay in vregs for the whole kernel) ----
    w0f_h = w0f_h_ref[...]
    w0b_h = w0b_h_ref[...]
    w1_h = w1_h_ref[...]

    # ---- layer-0 input projections, ALL timesteps, BOTH directions: one MXU matmul ----
    gx = jnp.dot(x_ref[...], w0x_ref[...], preferred_element_type=f32) + b0_ref[...]
    gx_f = gx[:, :G]          # (T*B, 4H)
    gx_b = gx[:, G:]          # (T*B, 4H)

    def cell(gates, c_prev):
        # PyTorch gate order: i, f, g, o
        i = jax.nn.sigmoid(gates[:, 0 * H:1 * H])
        f = jax.nn.sigmoid(gates[:, 1 * H:2 * H])
        g = jnp.tanh(gates[:, 2 * H:3 * H])
        o = jax.nn.sigmoid(gates[:, 3 * H:4 * H])
        c = f * c_prev + i * g
        return o * jnp.tanh(c), c

    zeros = jnp.zeros((B, H), f32)

    # ---- loop 1: layer-0 forward (t = s) and backward (t = T-1-s), interleaved ----
    # The two recurrence chains are independent -> their matmuls pipeline on the MXU.
    h_f, c_f = zeros, zeros
    h_b, c_b = zeros, zeros
    for s in range(T):
        t_b = T - 1 - s
        gates_f = gx_f[s * B:(s + 1) * B, :] + jnp.dot(h_f, w0f_h, preferred_element_type=f32)
        gates_b = gx_b[t_b * B:(t_b + 1) * B, :] + jnp.dot(h_b, w0b_h, preferred_element_type=f32)
        h_f, c_f = cell(gates_f, c_f)
        h_b, c_b = cell(gates_b, c_b)
        # stash per-step layer-0 outputs (layer-1 input) in VMEM scratch
        seq_ref[s * B:(s + 1) * B, 0:H] = h_f
        seq_ref[t_b * B:(t_b + 1) * B, H:2 * H] = h_b

    # ---- layer-1 input projection for ALL timesteps: one MXU matmul (bias folded) ----
    gx1 = jnp.dot(seq_ref[...], w1_x_ref[...], preferred_element_type=f32) + b1_ref[...]

    # ---- loop 2: layer-1 backward only (forward dir + seq outputs are dead compute) ----
    h1, c1 = zeros, zeros
    for s in range(T):
        t = T - 1 - s
        gates_1 = gx1[t * B:(t + 1) * B, :] + jnp.dot(h1, w1_h, preferred_element_type=f32)
        h1, c1 = cell(gates_1, c1)

    # ---- fc epilogue: ReLU(fc(ReLU(h[3]))) ----
    h1 = jnp.maximum(h1, 0.0)
    y = jnp.dot(h1, fcw_ref[...], preferred_element_type=f32) + fcb_ref[...]
    out_ref[...] = jnp.maximum(y, 0.0)


# ----------------------------------------------------------------------------
# Wrapper: one pallas_call; all weight transposes / concats done once on host.
# ----------------------------------------------------------------------------
def bilstm_forward(x, params):
    B, T, D = x.shape
    lp0 = params["lstm"][0]
    lp1 = params["lstm"][1]
    H = lp0["fwd"][1].shape[1]
    O = params["fc_w"].shape[0]

    def prep(w_ih, w_hh, b_ih, b_hh):
        return (w_ih.T.astype(jnp.float32),
                w_hh.T.astype(jnp.float32),
                (b_ih + b_hh).reshape(1, -1).astype(jnp.float32))

    w0f_x, w0f_h, b0f = prep(*lp0["fwd"])
    w0b_x, w0b_h, b0b = prep(*lp0["bwd"])
    w1_x, w1_h, b1 = prep(*lp1["bwd"])

    # concat layer-0 fwd/bwd input-projection weights -> single prologue matmul
    w0x = jnp.concatenate([w0f_x, w0b_x], axis=1)   # (D, 8H)
    b0 = jnp.concatenate([b0f, b0b], axis=1)        # (1, 8H)

    x_flat = jnp.transpose(x, (1, 0, 2)).reshape(T * B, D).astype(jnp.float32)
    fcw = params["fc_w"].T.astype(jnp.float32)
    fcb = params["fc_b"].reshape(1, O).astype(jnp.float32)

    vmem = pl.BlockSpec(memory_space=pltpu.MemorySpace.VMEM)
    return pl.pallas_call(
        bilstm_fused_kernel,
        out_shape=jax.ShapeDtypeStruct((B, O), jnp.float32),
        in_specs=[vmem] * 10,
        out_specs=vmem,
        scratch_shapes=[pltpu.VMEM((T * B, 2 * H), jnp.float32)],
    )(x_flat, w0x, b0, w0f_h, w0b_h, w1_x, w1_h, b1, fcw, fcb)


# ----------------------------------------------------------------------------
# Pure-JAX reference (full 2-layer bidirectional LSTM, for correctness check)
# ----------------------------------------------------------------------------
def ref_direction(x_bm, w_ih, w_hh, b_ih, b_hh):
    B, T, D = x_bm.shape
    H = w_hh.shape[1]

    def step(carry, x_t):
        h, c = carry
        gates = x_t @ w_ih.T + h @ w_hh.T + b_ih + b_hh
        i, f, g, o = jnp.split(gates, 4, axis=-1)
        c = jax.nn.sigmoid(f) * c + jax.nn.sigmoid(i) * jnp.tanh(g)
        h = jax.nn.sigmoid(o) * jnp.tanh(c)
        return (h, c), h

    (h, _), outs = jax.lax.scan(step, (jnp.zeros((B, H)), jnp.zeros((B, H))),
                                jnp.transpose(x_bm, (1, 0, 2)))
    return jnp.transpose(outs, (1, 0, 2)), h


def ref_forward(x, params):
    h_list = []
    layer_in = x
    for lp in params["lstm"]:
        out_f, h_f = ref_direction(layer_in, *lp["fwd"])
        out_b_rev, h_b = ref_direction(layer_in[:, ::-1, :], *lp["bwd"])
        layer_in = jnp.concatenate([out_f, out_b_rev[:, ::-1, :]], axis=-1)
        h_list += [h_f, h_b]
    h3 = jnp.maximum(h_list[3], 0.0)
    return jnp.maximum(h3 @ params["fc_w"].T + params["fc_b"], 0.0)


# ----------------------------------------------------------------------------
# Deterministic parameter init (PyTorch-default-like U(-1/sqrt(H), 1/sqrt(H)))
# ----------------------------------------------------------------------------
def init_params(key, in_dim, hidden, num_layers, out_dim):
    k = 1.0 / jnp.sqrt(hidden)
    lstm = []
    for layer in range(num_layers):
        d_in = in_dim if layer == 0 else 2 * hidden
        dirs = {}
        for name in ("fwd", "bwd"):
            key, k1, k2, k3, k4 = jax.random.split(key, 5)
            dirs[name] = (
                jax.random.uniform(k1, (4 * hidden, d_in), jnp.float32, -k, k),
                jax.random.uniform(k2, (4 * hidden, hidden), jnp.float32, -k, k),
                jax.random.uniform(k3, (4 * hidden,), jnp.float32, -k, k),
                jax.random.uniform(k4, (4 * hidden,), jnp.float32, -k, k),
            )
        lstm.append(dirs)
    key, kw, kb = jax.random.split(key, 3)
    kf = 1.0 / jnp.sqrt(hidden)
    fc_w = jax.random.uniform(kw, (out_dim, hidden), jnp.float32, -kf, kf)
    fc_b = jax.random.uniform(kb, (out_dim,), jnp.float32, -kf, kf)
    return {"lstm": lstm, "fc_w": fc_w, "fc_b": fc_b}


if __name__ == "__main__":
    B, T, IN_DIM, HIDDEN, NUM_LAYERS, OUT_DIM = 2, 8, 16, 32, 2, 10

    key = jax.random.PRNGKey(0)
    key, kx = jax.random.split(key)
    x = jax.random.normal(kx, (B, T, IN_DIM), jnp.float32)
    params = init_params(key, IN_DIM, HIDDEN, NUM_LAYERS, OUT_DIM)

    out = bilstm_forward(x, params)
    out = jax.block_until_ready(out)

    ref = ref_forward(x, params)
    assert out.shape == (B, OUT_DIM)
    assert jnp.allclose(out, ref, atol=1e-4, rtol=1e-4), "mismatch vs JAX reference"

    print("KERNEL_OK")
</pallas_src>

<mosaic_0001>
module attributes {stable_mosaic.version = 11 : i64} {
  func.func @bilstm_fused_kernel(%arg0: memref<16x16xf32, #tpu.memory_space<vmem>>, %arg1: memref<16x256xf32, #tpu.memory_space<vmem>>, %arg2: memref<1x256xf32, #tpu.memory_space<vmem>>, %arg3: memref<32x128xf32, #tpu.memory_space<vmem>>, %arg4: memref<32x128xf32, #tpu.memory_space<vmem>>, %arg5: memref<64x128xf32, #tpu.memory_space<vmem>>, %arg6: memref<32x128xf32, #tpu.memory_space<vmem>>, %arg7: memref<1x128xf32, #tpu.memory_space<vmem>>, %arg8: memref<32x10xf32, #tpu.memory_space<vmem>>, %arg9: memref<1x10xf32, #tpu.memory_space<vmem>>, %arg10: memref<2x10xf32, #tpu.memory_space<vmem>>, %arg11: memref<16x64xf32, #tpu.memory_space<vmem>>) attributes {dimension_semantics = [], scalar_prefetch = 0 : i64, scratch_operands = 1 : i64, tpu.core_type = #tpu.core_type<tc>} {
    %c0 = arith.constant 0 : index
    %c0_0 = arith.constant 0 : index
    %0 = vector.load %arg3[%c0, %c0_0] : memref<32x128xf32, #tpu.memory_space<vmem>>, vector<32x128xf32>
    %c0_1 = arith.constant 0 : index
    %c0_2 = arith.constant 0 : index
    %1 = vector.load %arg4[%c0_1, %c0_2] : memref<32x128xf32, #tpu.memory_space<vmem>>, vector<32x128xf32>
    %c0_3 = arith.constant 0 : index
    %c0_4 = arith.constant 0 : index
    %2 = vector.load %arg6[%c0_3, %c0_4] : memref<32x128xf32, #tpu.memory_space<vmem>>, vector<32x128xf32>
    %c0_5 = arith.constant 0 : index
    %c0_6 = arith.constant 0 : index
    %3 = vector.load %arg0[%c0_5, %c0_6] : memref<16x16xf32, #tpu.memory_space<vmem>>, vector<16x16xf32>
    %c0_7 = arith.constant 0 : index
    %c0_8 = arith.constant 0 : index
    %4 = vector.load %arg1[%c0_7, %c0_8] : memref<16x256xf32, #tpu.memory_space<vmem>>, vector<16x256xf32>
    %cst = arith.constant dense<0.000000e+00> : vector<16x256xf32>
    %5 = tpu.matmul %3, %4, %cst {dimension_numbers = #tpu.dot_dimension_numbers<[1], [0], [0], [1], [0, 0, 1, 1], [], []>} : vector<16x16xf32>, vector<16x256xf32>, vector<16x256xf32> -> vector<16x256xf32>
    %c0_9 = arith.constant 0 : index
    %c0_10 = arith.constant 0 : index
    %6 = vector.load %arg2[%c0_9, %c0_10] : memref<1x256xf32, #tpu.memory_space<vmem>>, vector<1x256xf32>
    %7 = vector.broadcast %6 : vector<1x256xf32> to vector<16x256xf32>
    %8 = arith.addf %5, %7 : vector<16x256xf32>
    %9 = vector.extract_strided_slice %8 {offsets = [0, 0], sizes = [16, 128], strides = [1, 1]} : vector<16x256xf32> to vector<16x128xf32>
    %10 = vector.extract_strided_slice %8 {offsets = [0, 128], sizes = [16, 128], strides = [1, 1]} : vector<16x256xf32> to vector<16x128xf32>
    %cst_11 = arith.constant 0.000000e+00 : f32
    %11 = vector.broadcast %cst_11 : f32 to vector<2x32xf32>
    %12 = vector.extract_strided_slice %9 {offsets = [0, 0], sizes = [2, 128], strides = [1, 1]} : vector<16x128xf32> to vector<2x128xf32>
    %cst_12 = arith.constant dense<0.000000e+00> : vector<2x128xf32>
    %13 = tpu.matmul %11, %0, %cst_12 {dimension_numbers = #tpu.dot_dimension_numbers<[1], [0], [0], [1], [0, 0, 1, 1], [], []>} : vector<2x32xf32>, vector<32x128xf32>, vector<2x128xf32> -> vector<2x128xf32>
    %14 = arith.addf %12, %13 : vector<2x128xf32>
    %15 = vector.extract_strided_slice %10 {offsets = [14, 0], sizes = [2, 128], strides = [1, 1]} : vector<16x128xf32> to vector<2x128xf32>
    %cst_13 = arith.constant dense<0.000000e+00> : vector<2x128xf32>
    %16 = tpu.matmul %11, %1, %cst_13 {dimension_numbers = #tpu.dot_dimension_numbers<[1], [0], [0], [1], [0, 0, 1, 1], [], []>} : vector<2x32xf32>, vector<32x128xf32>, vector<2x128xf32> -> vector<2x128xf32>
    %17 = arith.addf %15, %16 : vector<2x128xf32>
    %18 = vector.extract_strided_slice %14 {offsets = [0, 0], sizes = [2, 32], strides = [1, 1]} : vector<2x128xf32> to vector<2x32xf32>
    %19 = arith.negf %18 : vector<2x32xf32>
    %20 = math.exp %19 : vector<2x32xf32>
    %cst_14 = arith.constant 1.000000e+00 : f32
    %21 = vector.broadcast %cst_14 : f32 to vector<2x32xf32>
    %22 = arith.addf %21, %20 : vector<2x32xf32>
    %23 = arith.divf %21, %22 : vector<2x32xf32>
    %24 = vector.extract_strided_slice %14 {offsets = [0, 32], sizes = [2, 32], strides = [1, 1]} : vector<2x128xf32> to vector<2x32xf32>
    %25 = arith.negf %24 : vector<2x32xf32>
    %26 = math.exp %25 : vector<2x32xf32>
    %cst_15 = arith.constant 1.000000e+00 : f32
    %27 = vector.broadcast %cst_15 : f32 to vector<2x32xf32>
    %28 = arith.addf %27, %26 : vector<2x32xf32>
    %29 = arith.divf %27, %28 : vector<2x32xf32>
    %30 = vector.extract_strided_slice %14 {offsets = [0, 64], sizes = [2, 32], strides = [1, 1]} : vector<2x128xf32> to vector<2x32xf32>
    %31 = math.tanh %30 : vector<2x32xf32>
    %32 = vector.extract_strided_slice %14 {offsets = [0, 96], sizes = [2, 32], strides = [1, 1]} : vector<2x128xf32> to vector<2x32xf32>
    %33 = arith.negf %32 : vector<2x32xf32>
    %34 = math.exp %33 : vector<2x32xf32>
    %cst_16 = arith.constant 1.000000e+00 : f32
    %35 = vector.broadcast %cst_16 : f32 to vector<2x32xf32>
    %36 = arith.addf %35, %34 : vector<2x32xf32>
    %37 = arith.divf %35, %36 : vector<2x32xf32>
    %38 = arith.mulf %29, %11 : vector<2x32xf32>
    %39 = arith.mulf %23, %31 : vector<2x32xf32>
    %40 = arith.addf %38, %39 : vector<2x32xf32>
    %41 = math.tanh %40 : vector<2x32xf32>
    %42 = arith.mulf %37, %41 : vector<2x32xf32>
    %43 = vector.extract_strided_slice %17 {offsets = [0, 0], sizes = [2, 32], strides = [1, 1]} : vector<2x128xf32> to vector<2x32xf32>
    %44 = arith.negf %43 : vector<2x32xf32>
    %45 = math.exp %44 : vector<2x32xf32>
    %cst_17 = arith.constant 1.000000e+00 : f32
    %46 = vector.broadcast %cst_17 : f32 to vector<2x32xf32>
    %47 = arith.addf %46, %45 : vector<2x32xf32>
    %48 = arith.divf %46, %47 : vector<2x32xf32>
    %49 = vector.extract_strided_slice %17 {offsets = [0, 32], sizes = [2, 32], strides = [1, 1]} : vector<2x128xf32> to vector<2x32xf32>
    %50 = arith.negf %49 : vector<2x32xf32>
    %51 = math.exp %50 : vector<2x32xf32>
    %cst_18 = arith.constant 1.000000e+00 : f32
    %52 = vector.broadcast %cst_18 : f32 to vector<2x32xf32>
    %53 = arith.addf %52, %51 : vector<2x32xf32>
    %54 = arith.divf %52, %53 : vector<2x32xf32>
    %55 = vector.extract_strided_slice %17 {offsets = [0, 64], sizes = [2, 32], strides = [1, 1]} : vector<2x128xf32> to vector<2x32xf32>
    %56 = math.tanh %55 : vector<2x32xf32>
    %57 = vector.extract_strided_slice %17 {offsets = [0, 96], sizes = [2, 32], strides = [1, 1]} : vector<2x128xf32> to vector<2x32xf32>
    %58 = arith.negf %57 : vector<2x32xf32>
    %59 = math.exp %58 : vector<2x32xf32>
    %cst_19 = arith.constant 1.000000e+00 : f32
    %60 = vector.broadcast %cst_19 : f32 to vector<2x32xf32>
    %61 = arith.addf %60, %59 : vector<2x32xf32>
    %62 = arith.divf %60, %61 : vector<2x32xf32>
    %63 = arith.mulf %54, %11 : vector<2x32xf32>
    %64 = arith.mulf %48, %56 : vector<2x32xf32>
    %65 = arith.addf %63, %64 : vector<2x32xf32>
    %66 = math.tanh %65 : vector<2x32xf32>
    %67 = arith.mulf %62, %66 : vector<2x32xf32>
    %c0_20 = arith.constant 0 : index
    %c0_21 = arith.constant 0 : index
    %68 = vector.load %arg11[%c0_20, %c0_21] : memref<16x64xf32, #tpu.memory_space<vmem>>, vector<2x32xf32>
    tpu.vector_store %arg11[%c0_20, %c0_21], %42 {strides = array<i32>} : memref<16x64xf32, #tpu.memory_space<vmem>>, vector<2x32xf32>,
    %c14 = arith.constant 14 : index
    %c32 = arith.constant 32 : index
    %69 = vector.load %arg11[%c14, %c32] : memref<16x64xf32, #tpu.memory_space<vmem>>, vector<2x32xf32>
    tpu.vector_store %arg11[%c14, %c32], %67 {strides = array<i32>} : memref<16x64xf32, #tpu.memory_space<vmem>>, vector<2x32xf32>,
    %70 = vector.extract_strided_slice %9 {offsets = [2, 0], sizes = [2, 128], strides = [1, 1]} : vector<16x128xf32> to vector<2x128xf32>
    %cst_22 = arith.constant dense<0.000000e+00> : vector<2x128xf32>
    %71 = tpu.matmul %42, %0, %cst_22 {dimension_numbers = #tpu.dot_dimension_numbers<[1], [0], [0], [1], [0, 0, 1, 1], [], []>} : vector<2x32xf32>, vector<32x128xf32>, vector<2x128xf32> -> vector<2x128xf32>
    %72 = arith.addf %70, %71 : vector<2x128xf32>
    %73 = vector.extract_strided_slice %10 {offsets = [12, 0], sizes = [2, 128], strides = [1, 1]} : vector<16x128xf32> to vector<2x128xf32>
    %cst_23 = arith.constant dense<0.000000e+00> : vector<2x128xf32>
    %74 = tpu.matmul %67, %1, %cst_23 {dimension_numbers = #tpu.dot_dimension_numbers<[1], [0], [0], [1], [0, 0, 1, 1], [], []>} : vector<2x32xf32>, vector<32x128xf32>, vector<2x128xf32> -> vector<2x128xf32>
    %75 = arith.addf %73, %74 : vector<2x128xf32>
    %76 = vector.extract_strided_slice %72 {offsets = [0, 0], sizes = [2, 32], strides = [1, 1]} : vector<2x128xf32> to vector<2x32xf32>
    %77 = arith.negf %76 : vector<2x32xf32>
    %78 = math.exp %77 : vector<2x32xf32>
    %cst_24 = arith.constant 1.000000e+00 : f32
    %79 = vector.broadcast %cst_24 : f32 to vector<2x32xf32>
    %80 = arith.addf %79, %78 : vector<2x32xf32>
    %81 = arith.divf %79, %80 : vector<2x32xf32>
    %82 = vector.extract_strided_slice %72 {offsets = [0, 32], sizes = [2, 32], strides = [1, 1]} : vector<2x128xf32> to vector<2x32xf32>
    %83 = arith.negf %82 : vector<2x32xf32>
    %84 = math.exp %83 : vector<2x32xf32>
    %cst_25 = arith.constant 1.000000e+00 : f32
    %85 = vector.broadcast %cst_25 : f32 to vector<2x32xf32>
    %86 = arith.addf %85, %84 : vector<2x32xf32>
    %87 = arith.divf %85, %86 : vector<2x32xf32>
    %88 = vector.extract_strided_slice %72 {offsets = [0, 64], sizes = [2, 32], strides = [1, 1]} : vector<2x128xf32> to vector<2x32xf32>
    %89 = math.tanh %88 : vector<2x32xf32>
    %90 = vector.extract_strided_slice %72 {offsets = [0, 96], sizes = [2, 32], strides = [1, 1]} : vector<2x128xf32> to vector<2x32xf32>
    %91 = arith.negf %90 : vector<2x32xf32>
    %92 = math.exp %91 : vector<2x32xf32>
    %cst_26 = arith.constant 1.000000e+00 : f32
    %93 = vector.broadcast %cst_26 : f32 to vector<2x32xf32>
    %94 = arith.addf %93, %92 : vector<2x32xf32>
    %95 = arith.divf %93, %94 : vector<2x32xf32>
    %96 = arith.mulf %87, %40 : vector<2x32xf32>
    %97 = arith.mulf %81, %89 : vector<2x32xf32>
    %98 = arith.addf %96, %97 : vector<2x32xf32>
    %99 = math.tanh %98 : vector<2x32xf32>
    %100 = arith.mulf %95, %99 : vector<2x32xf32>
    %101 = vector.extract_strided_slice %75 {offsets = [0, 0], sizes = [2, 32], strides = [1, 1]} : vector<2x128xf32> to vector<2x32xf32>
    %102 = arith.negf %101 : vector<2x32xf32>
    %103 = math.exp %102 : vector<2x32xf32>
    %cst_27 = arith.constant 1.000000e+00 : f32
    %104 = vector.broadcast %cst_27 : f32 to vector<2x32xf32>
    %105 = arith.addf %104, %103 : vector<2x32xf32>
    %106 = arith.divf %104, %105 : vector<2x32xf32>
    %107 = vector.extract_strided_slice %75 {offsets = [0, 32], sizes = [2, 32], strides = [1, 1]} : vector<2x128xf32> to vector<2x32xf32>
    %108 = arith.negf %107 : vector<2x32xf32>
    %109 = math.exp %108 : vector<2x32xf32>
    %cst_28 = arith.constant 1.000000e+00 : f32
    %110 = vector.broadcast %cst_28 : f32 to vector<2x32xf32>
    %111 = arith.addf %110, %109 : vector<2x32xf32>
    %112 = arith.divf %110, %111 : vector<2x32xf32>
    %113 = vector.extract_strided_slice %75 {offsets = [0, 64], sizes = [2, 32], strides = [1, 1]} : vector<2x128xf32> to vector<2x32xf32>
    %114 = math.tanh %113 : vector<2x32xf32>
    %115 = vector.extract_strided_slice %75 {offsets = [0, 96], sizes = [2, 32], strides = [1, 1]} : vector<2x128xf32> to vector<2x32xf32>
    %116 = arith.negf %115 : vector<2x32xf32>
    %117 = math.exp %116 : vector<2x32xf32>
    %cst_29 = arith.constant 1.000000e+00 : f32
    %118 = vector.broadcast %cst_29 : f32 to vector<2x32xf32>
    %119 = arith.addf %118, %117 : vector<2x32xf32>
    %120 = arith.divf %118, %119 : vector<2x32xf32>
    %121 = arith.mulf %112, %65 : vector<2x32xf32>
    %122 = arith.mulf %106, %114 : vector<2x32xf32>
    %123 = arith.addf %121, %122 : vector<2x32xf32>
    %124 = math.tanh %123 : vector<2x32xf32>
    %125 = arith.mulf %120, %124 : vector<2x32xf32>
    %c2 = arith.constant 2 : index
    %c0_30 = arith.constant 0 : index
    %126 = vector.load %arg11[%c2, %c0_30] : memref<16x64xf32, #tpu.memory_space<vmem>>, vector<2x32xf32>
    tpu.vector_store %arg11[%c2, %c0_30], %100 {strides = array<i32>} : memref<16x64xf32, #tpu.memory_space<vmem>>, vector<2x32xf32>,
    %c12 = arith.constant 12 : index
    %c32_31 = arith.constant 32 : index
    %127 = vector.load %arg11[%c12, %c32_31] : memref<16x64xf32, #tpu.memory_space<vmem>>, vector<2x32xf32>
    tpu.vector_store %arg11[%c12, %c32_31], %125 {strides = array<i32>} : memref<16x64xf32, #tpu.memory_space<vmem>>, vector<2x32xf32>,
    %128 = vector.extract_strided_slice %9 {offsets = [4, 0], sizes = [2, 128], strides = [1, 1]} : vector<16x128xf32> to vector<2x128xf32>
    %cst_32 = arith.constant dense<0.000000e+00> : vector<2x128xf32>
    %129 = tpu.matmul %100, %0, %cst_32 {dimension_numbers = #tpu.dot_dimension_numbers<[1], [0], [0], [1], [0, 0, 1, 1], [], []>} : vector<2x32xf32>, vector<32x128xf32>, vector<2x128xf32> -> vector<2x128xf32>
    %130 = arith.addf %128, %129 : vector<2x128xf32>
    %131 = vector.extract_strided_slice %10 {offsets = [10, 0], sizes = [2, 128], strides = [1, 1]} : vector<16x128xf32> to vector<2x128xf32>
    %cst_33 = arith.constant dense<0.000000e+00> : vector<2x128xf32>
    %132 = tpu.matmul %125, %1, %cst_33 {dimension_numbers = #tpu.dot_dimension_numbers<[1], [0], [0], [1], [0, 0, 1, 1], [], []>} : vector<2x32xf32>, vector<32x128xf32>, vector<2x128xf32> -> vector<2x128xf32>
    %133 = arith.addf %131, %132 : vector<2x128xf32>
    %134 = vector.extract_strided_slice %130 {offsets = [0, 0], sizes = [2, 32], strides = [1, 1]} : vector<2x128xf32> to vector<2x32xf32>
    %135 = arith.negf %134 : vector<2x32xf32>
    %136 = math.exp %135 : vector<2x32xf32>
    %cst_34 = arith.constant 1.000000e+00 : f32
    %137 = vector.broadcast %cst_34 : f32 to vector<2x32xf32>
    %138 = arith.addf %137, %136 : vector<2x32xf32>
    %139 = arith.divf %137, %138 : vector<2x32xf32>
    %140 = vector.extract_strided_slice %130 {offsets = [0, 32], sizes = [2, 32], strides = [1, 1]} : vector<2x128xf32> to vector<2x32xf32>
    %141 = arith.negf %140 : vector<2x32xf32>
    %142 = math.exp %141 : vector<2x32xf32>
    %cst_35 = arith.constant 1.000000e+00 : f32
    %143 = vector.broadcast %cst_35 : f32 to vector<2x32xf32>
    %144 = arith.addf %143, %142 : vector<2x32xf32>
    %145 = arith.divf %143, %144 : vector<2x32xf32>
    %146 = vector.extract_strided_slice %130 {offsets = [0, 64], sizes = [2, 32], strides = [1, 1]} : vector<2x128xf32> to vector<2x32xf32>
    %147 = math.tanh %146 : vector<2x32xf32>
    %148 = vector.extract_strided_slice %130 {offsets = [0, 96], sizes = [2, 32], strides = [1, 1]} : vector<2x128xf32> to vector<2x32xf32>
    %149 = arith.negf %148 : vector<2x32xf32>
    %150 = math.exp %149 : vector<2x32xf32>
    %cst_36 = arith.constant 1.000000e+00 : f32
    %151 = vector.broadcast %cst_36 : f32 to vector<2x32xf32>
    %152 = arith.addf %151, %150 : vector<2x32xf32>
    %153 = arith.divf %151, %152 : vector<2x32xf32>
    %154 = arith.mulf %145, %98 : vector<2x32xf32>
    %155 = arith.mulf %139, %147 : vector<2x32xf32>
    %156 = arith.addf %154, %155 : vector<2x32xf32>
    %157 = math.tanh %156 : vector<2x32xf32>
    %158 = arith.mulf %153, %157 : vector<2x32xf32>
    %159 = vector.extract_strided_slice %133 {offsets = [0, 0], sizes = [2, 32], strides = [1, 1]} : vector<2x128xf32> to vector<2x32xf32>
    %160 = arith.negf %159 : vector<2x32xf32>
    %161 = math.exp %160 : vector<2x32xf32>
    %cst_37 = arith.constant 1.000000e+00 : f32
    %162 = vector.broadcast %cst_37 : f32 to vector<2x32xf32>
    %163 = arith.addf %162, %161 : vector<2x32xf32>
    %164 = arith.divf %162, %163 : vector<2x32xf32>
    %165 = vector.extract_strided_slice %133 {offsets = [0, 32], sizes = [2, 32], strides = [1, 1]} : vector<2x128xf32> to vector<2x32xf32>
    %166 = arith.negf %165 : vector<2x32xf32>
    %167 = math.exp %166 : vector<2x32xf32>
    %cst_38 = arith.constant 1.000000e+00 : f32
    %168 = vector.broadcast %cst_38 : f32 to vector<2x32xf32>
    %169 = arith.addf %168, %167 : vector<2x32xf32>
    %170 = arith.divf %168, %169 : vector<2x32xf32>
    %171 = vector.extract_strided_slice %133 {offsets = [0, 64], sizes = [2, 32], strides = [1, 1]} : vector<2x128xf32> to vector<2x32xf32>
    %172 = math.tanh %171 : vector<2x32xf32>
    %173 = vector.extract_strided_slice %133 {offsets = [0, 96], sizes = [2, 32], strides = [1, 1]} : vector<2x128xf32> to vector<2x32xf32>
    %174 = arith.negf %173 : vector<2x32xf32>
    %175 = math.exp %174 : vector<2x32xf32>
    %cst_39 = arith.constant 1.000000e+00 : f32
    %176 = vector.broadcast %cst_39 : f32 to vector<2x32xf32>
    %177 = arith.addf %176, %175 : vector<2x32xf32>
    %178 = arith.divf %176, %177 : vector<2x32xf32>
    %179 = arith.mulf %170, %123 : vector<2x32xf32>
    %180 = arith.mulf %164, %172 : vector<2x32xf32>
    %181 = arith.addf %179, %180 : vector<2x32xf32>
    %182 = math.tanh %181 : vector<2x32xf32>
    %183 = arith.mulf %178, %182 : vector<2x32xf32>
    %c4 = arith.constant 4 : index
    %c0_40 = arith.constant 0 : index
    %184 = vector.load %arg11[%c4, %c0_40] : memref<16x64xf32, #tpu.memory_space<vmem>>, vector<2x32xf32>
    tpu.vector_store %arg11[%c4, %c0_40], %158 {strides = array<i32>} : memref<16x64xf32, #tpu.memory_space<vmem>>, vector<2x32xf32>,
    %c10 = arith.constant 10 : index
    %c32_41 = arith.constant 32 : index
    %185 = vector.load %arg11[%c10, %c32_41] : memref<16x64xf32, #tpu.memory_space<vmem>>, vector<2x32xf32>
    tpu.vector_store %arg11[%c10, %c32_41], %183 {strides = array<i32>} : memref<16x64xf32, #tpu.memory_space<vmem>>, vector<2x32xf32>,
    %186 = vector.extract_strided_slice %9 {offsets = [6, 0], sizes = [2, 128], strides = [1, 1]} : vector<16x128xf32> to vector<2x128xf32>
    %cst_42 = arith.constant dense<0.000000e+00> : vector<2x128xf32>
    %187 = tpu.matmul %158, %0, %cst_42 {dimension_numbers = #tpu.dot_dimension_numbers<[1], [0], [0], [1], [0, 0, 1, 1], [], []>} : vector<2x32xf32>, vector<32x128xf32>, vector<2x128xf32> -> vector<2x128xf32>
    %188 = arith.addf %186, %187 : vector<2x128xf32>
    %189 = vector.extract_strided_slice %10 {offsets = [8, 0], sizes = [2, 128], strides = [1, 1]} : vector<16x128xf32> to vector<2x128xf32>
    %cst_43 = arith.constant dense<0.000000e+00> : vector<2x128xf32>
    %190 = tpu.matmul %183, %1, %cst_43 {dimension_numbers = #tpu.dot_dimension_numbers<[1], [0], [0], [1], [0, 0, 1, 1], [], []>} : vector<2x32xf32>, vector<32x128xf32>, vector<2x128xf32> -> vector<2x128xf32>
    %191 = arith.addf %189, %190 : vector<2x128xf32>
    %192 = vector.extract_strided_slice %188 {offsets = [0, 0], sizes = [2, 32], strides = [1, 1]} : vector<2x128xf32> to vector<2x32xf32>
    %193 = arith.negf %192 : vector<2x32xf32>
    %194 = math.exp %193 : vector<2x32xf32>
    %cst_44 = arith.constant 1.000000e+00 : f32
    %195 = vector.broadcast %cst_44 : f32 to vector<2x32xf32>
    %196 = arith.addf %195, %194 : vector<2x32xf32>
    %197 = arith.divf %195, %196 : vector<2x32xf32>
    %198 = vector.extract_strided_slice %188 {offsets = [0, 32], sizes = [2, 32], strides = [1, 1]} : vector<2x128xf32> to vector<2x32xf32>
    %199 = arith.negf %198 : vector<2x32xf32>
    %200 = math.exp %199 : vector<2x32xf32>
    %cst_45 = arith.constant 1.000000e+00 : f32
    %201 = vector.broadcast %cst_45 : f32 to vector<2x32xf32>
    %202 = arith.addf %201, %200 : vector<2x32xf32>
    %203 = arith.divf %201, %202 : vector<2x32xf32>
    %204 = vector.extract_strided_slice %188 {offsets = [0, 64], sizes = [2, 32], strides = [1, 1]} : vector<2x128xf32> to vector<2x32xf32>
    %205 = math.tanh %204 : vector<2x32xf32>
    %206 = vector.extract_strided_slice %188 {offsets = [0, 96], sizes = [2, 32], strides = [1, 1]} : vector<2x128xf32> to vector<2x32xf32>
    %207 = arith.negf %206 : vector<2x32xf32>
    %208 = math.exp %207 : vector<2x32xf32>
    %cst_46 = arith.constant 1.000000e+00 : f32
    %209 = vector.broadcast %cst_46 : f32 to vector<2x32xf32>
    %210 = arith.addf %209, %208 : vector<2x32xf32>
    %211 = arith.divf %209, %210 : vector<2x32xf32>
    %212 = arith.mulf %203, %156 : vector<2x32xf32>
    %213 = arith.mulf %197, %205 : vector<2x32xf32>
    %214 = arith.addf %212, %213 : vector<2x32xf32>
    %215 = math.tanh %214 : vector<2x32xf32>
    %216 = arith.mulf %211, %215 : vector<2x32xf32>
    %217 = vector.extract_strided_slice %191 {offsets = [0, 0], sizes = [2, 32], strides = [1, 1]} : vector<2x128xf32> to vector<2x32xf32>
    %218 = arith.negf %217 : vector<2x32xf32>
    %219 = math.exp %218 : vector<2x32xf32>
    %cst_47 = arith.constant 1.000000e+00 : f32
    %220 = vector.broadcast %cst_47 : f32 to vector<2x32xf32>
    %221 = arith.addf %220, %219 : vector<2x32xf32>
    %222 = arith.divf %220, %221 : vector<2x32xf32>
    %223 = vector.extract_strided_slice %191 {offsets = [0, 32], sizes = [2, 32], strides = [1, 1]} : vector<2x128xf32> to vector<2x32xf32>
    %224 = arith.negf %223 : vector<2x32xf32>
    %225 = math.exp %224 : vector<2x32xf32>
    %cst_48 = arith.constant 1.000000e+00 : f32
    %226 = vector.broadcast %cst_48 : f32 to vector<2x32xf32>
    %227 = arith.addf %226, %225 : vector<2x32xf32>
    %228 = arith.divf %226, %227 : vector<2x32xf32>
    %229 = vector.extract_strided_slice %191 {offsets = [0, 64], sizes = [2, 32], strides = [1, 1]} : vector<2x128xf32> to vector<2x32xf32>
    %230 = math.tanh %229 : vector<2x32xf32>
    %231 = vector.extract_strided_slice %191 {offsets = [0, 96], sizes = [2, 32], strides = [1, 1]} : vector<2x128xf32> to vector<2x32xf32>
    %232 = arith.negf %231 : vector<2x32xf32>
    %233 = math.exp %232 : vector<2x32xf32>
    %cst_49 = arith.constant 1.000000e+00 : f32
    %234 = vector.broadcast %cst_49 : f32 to vector<2x32xf32>
    %235 = arith.addf %234, %233 : vector<2x32xf32>
    %236 = arith.divf %234, %235 : vector<2x32xf32>
    %237 = arith.mulf %228, %181 : vector<2x32xf32>
    %238 = arith.mulf %222, %230 : vector<2x32xf32>
    %239 = arith.addf %237, %238 : vector<2x32xf32>
    %240 = math.tanh %239 : vector<2x32xf32>
    %241 = arith.mulf %236, %240 : vector<2x32xf32>
    %c6 = arith.constant 6 : index
    %c0_50 = arith.constant 0 : index
    %242 = vector.load %arg11[%c6, %c0_50] : memref<16x64xf32, #tpu.memory_space<vmem>>, vector<2x32xf32>
    tpu.vector_store %arg11[%c6, %c0_50], %216 {strides = array<i32>} : memref<16x64xf32, #tpu.memory_space<vmem>>, vector<2x32xf32>,
    %c8 = arith.constant 8 : index
    %c32_51 = arith.constant 32 : index
    %243 = vector.load %arg11[%c8, %c32_51] : memref<16x64xf32, #tpu.memory_space<vmem>>, vector<2x32xf32>
    tpu.vector_store %arg11[%c8, %c32_51], %241 {strides = array<i32>} : memref<16x64xf32, #tpu.memory_space<vmem>>, vector<2x32xf32>,
    %244 = vector.extract_strided_slice %9 {offsets = [8, 0], sizes = [2, 128], strides = [1, 1]} : vector<16x128xf32> to vector<2x128xf32>
    %cst_52 = arith.constant dense<0.000000e+00> : vector<2x128xf32>
    %245 = tpu.matmul %216, %0, %cst_52 {dimension_numbers = #tpu.dot_dimension_numbers<[1], [0], [0], [1], [0, 0, 1, 1], [], []>} : vector<2x32xf32>, vector<32x128xf32>, vector<2x128xf32> -> vector<2x128xf32>
    %246 = arith.addf %244, %245 : vector<2x128xf32>
    %247 = vector.extract_strided_slice %10 {offsets = [6, 0], sizes = [2, 128], strides = [1, 1]} : vector<16x128xf32> to vector<2x128xf32>
    %cst_53 = arith.constant dense<0.000000e+00> : vector<2x128xf32>
    %248 = tpu.matmul %241, %1, %cst_53 {dimension_numbers = #tpu.dot_dimension_numbers<[1], [0], [0], [1], [0, 0, 1, 1], [], []>} : vector<2x32xf32>, vector<32x128xf32>, vector<2x128xf32> -> vector<2x128xf32>
    %249 = arith.addf %247, %248 : vector<2x128xf32>
    %250 = vector.extract_strided_slice %246 {offsets = [0, 0], sizes = [2, 32], strides = [1, 1]} : vector<2x128xf32> to vector<2x32xf32>
    %251 = arith.negf %250 : vector<2x32xf32>
    %252 = math.exp %251 : vector<2x32xf32>
    %cst_54 = arith.constant 1.000000e+00 : f32
    %253 = vector.broadcast %cst_54 : f32 to vector<2x32xf32>
    %254 = arith.addf %253, %252 : vector<2x32xf32>
    %255 = arith.divf %253, %254 : vector<2x32xf32>
    %256 = vector.extract_strided_slice %246 {offsets = [0, 32], sizes = [2, 32], strides = [1, 1]} : vector<2x128xf32> to vector<2x32xf32>
    %257 = arith.negf %256 : vector<2x32xf32>
    %258 = math.exp %257 : vector<2x32xf32>
    %cst_55 = arith.constant 1.000000e+00 : f32
    %259 = vector.broadcast %cst_55 : f32 to vector<2x32xf32>
    %260 = arith.addf %259, %258 : vector<2x32xf32>
    %261 = arith.divf %259, %260 : vector<2x32xf32>
    %262 = vector.extract_strided_slice %246 {offsets = [0, 64], sizes = [2, 32], strides = [1, 1]} : vector<2x128xf32> to vector<2x32xf32>
    %263 = math.tanh %262 : vector<2x32xf32>
    %264 = vector.extract_strided_slice %246 {offsets = [0, 96], sizes = [2, 32], strides = [1, 1]} : vector<2x128xf32> to vector<2x32xf32>
    %265 = arith.negf %264 : vector<2x32xf32>
    %266 = math.exp %265 : vector<2x32xf32>
    %cst_56 = arith.constant 1.000000e+00 : f32
    %267 = vector.broadcast %cst_56 : f32 to vector<2x32xf32>
    %268 = arith.addf %267, %266 : vector<2x32xf32>
    %269 = arith.divf %267, %268 : vector<2x32xf32>
    %270 = arith.mulf %261, %214 : vector<2x32xf32>
    %271 = arith.mulf %255, %263 : vector<2x32xf32>
    %272 = arith.addf %270, %271 : vector<2x32xf32>
    %273 = math.tanh %272 : vector<2x32xf32>
    %274 = arith.mulf %269, %273 : vector<2x32xf32>
    %275 = vector.extract_strided_slice %249 {offsets = [0, 0], sizes = [2, 32], strides = [1, 1]} : vector<2x128xf32> to vector<2x32xf32>
    %276 = arith.negf %275 : vector<2x32xf32>
    %277 = math.exp %276 : vector<2x32xf32>
    %cst_57 = arith.constant 1.000000e+00 : f32
    %278 = vector.broadcast %cst_57 : f32 to vector<2x32xf32>
    %279 = arith.addf %278, %277 : vector<2x32xf32>
    %280 = arith.divf %278, %279 : vector<2x32xf32>
    %281 = vector.extract_strided_slice %249 {offsets = [0, 32], sizes = [2, 32], strides = [1, 1]} : vector<2x128xf32> to vector<2x32xf32>
    %282 = arith.negf %281 : vector<2x32xf32>
    %283 = math.exp %282 : vector<2x32xf32>
    %cst_58 = arith.constant 1.000000e+00 : f32
    %284 = vector.broadcast %cst_58 : f32 to vector<2x32xf32>
    %285 = arith.addf %284, %283 : vector<2x32xf32>
    %286 = arith.divf %284, %285 : vector<2x32xf32>
    %287 = vector.extract_strided_slice %249 {offsets = [0, 64], sizes = [2, 32], strides = [1, 1]} : vector<2x128xf32> to vector<2x32xf32>
    %288 = math.tanh %287 : vector<2x32xf32>
    %289 = vector.extract_strided_slice %249 {offsets = [0, 96], sizes = [2, 32], strides = [1, 1]} : vector<2x128xf32> to vector<2x32xf32>
    %290 = arith.negf %289 : vector<2x32xf32>
    %291 = math.exp %290 : vector<2x32xf32>
    %cst_59 = arith.constant 1.000000e+00 : f32
    %292 = vector.broadcast %cst_59 : f32 to vector<2x32xf32>
    %293 = arith.addf %292, %291 : vector<2x32xf32>
    %294 = arith.divf %292, %293 : vector<2x32xf32>
    %295 = arith.mulf %286, %239 : vector<2x32xf32>
    %296 = arith.mulf %280, %288 : vector<2x32xf32>
    %297 = arith.addf %295, %296 : vector<2x32xf32>
    %298 = math.tanh %297 : vector<2x32xf32>
    %299 = arith.mulf %294, %298 : vector<2x32xf32>
    %c8_60 = arith.constant 8 : index
    %c0_61 = arith.constant 0 : index
    %300 = vector.load %arg11[%c8_60, %c0_61] : memref<16x64xf32, #tpu.memory_space<vmem>>, vector<2x32xf32>
    tpu.vector_store %arg11[%c8_60, %c0_61], %274 {strides = array<i32>} : memref<16x64xf32, #tpu.memory_space<vmem>>, vector<2x32xf32>,
    %c6_62 = arith.constant 6 : index
    %c32_63 = arith.constant 32 : index
    %301 = vector.load %arg11[%c6_62, %c32_63] : memref<16x64xf32, #tpu.memory_space<vmem>>, vector<2x32xf32>
    tpu.vector_store %arg11[%c6_62, %c32_63], %299 {strides = array<i32>} : memref<16x64xf32, #tpu.memory_space<vmem>>, vector<2x32xf32>,
    %302 = vector.extract_strided_slice %9 {offsets = [10, 0], sizes = [2, 128], strides = [1, 1]} : vector<16x128xf32> to vector<2x128xf32>
    %cst_64 = arith.constant dense<0.000000e+00> : vector<2x128xf32>
    %303 = tpu.matmul %274, %0, %cst_64 {dimension_numbers = #tpu.dot_dimension_numbers<[1], [0], [0], [1], [0, 0, 1, 1], [], []>} : vector<2x32xf32>, vector<32x128xf32>, vector<2x128xf32> -> vector<2x128xf32>
    %304 = arith.addf %302, %303 : vector<2x128xf32>
    %305 = vector.extract_strided_slice %10 {offsets = [4, 0], sizes = [2, 128], strides = [1, 1]} : vector<16x128xf32> to vector<2x128xf32>
    %cst_65 = arith.constant dense<0.000000e+00> : vector<2x128xf32>
    %306 = tpu.matmul %299, %1, %cst_65 {dimension_numbers = #tpu.dot_dimension_numbers<[1], [0], [0], [1], [0, 0, 1, 1], [], []>} : vector<2x32xf32>, vector<32x128xf32>, vector<2x128xf32> -> vector<2x128xf32>
    %307 = arith.addf %305, %306 : vector<2x128xf32>
    %308 = vector.extract_strided_slice %304 {offsets = [0, 0], sizes = [2, 32], strides = [1, 1]} : vector<2x128xf32> to vector<2x32xf32>
    %309 = arith.negf %308 : vector<2x32xf32>
    %310 = math.exp %309 : vector<2x32xf32>
    %cst_66 = arith.constant 1.000000e+00 : f32
    %311 = vector.broadcast %cst_66 : f32 to vector<2x32xf32>
    %312 = arith.addf %311, %310 : vector<2x32xf32>
    %313 = arith.divf %311, %312 : vector<2x32xf32>
    %314 = vector.extract_strided_slice %304 {offsets = [0, 32], sizes = [2, 32], strides = [1, 1]} : vector<2x128xf32> to vector<2x32xf32>
    %315 = arith.negf %314 : vector<2x32xf32>
    %316 = math.exp %315 : vector<2x32xf32>
    %cst_67 = arith.constant 1.000000e+00 : f32
    %317 = vector.broadcast %cst_67 : f32 to vector<2x32xf32>
    %318 = arith.addf %317, %316 : vector<2x32xf32>
    %319 = arith.divf %317, %318 : vector<2x32xf32>
    %320 = vector.extract_strided_slice %304 {offsets = [0, 64], sizes = [2, 32], strides = [1, 1]} : vector<2x128xf32> to vector<2x32xf32>
    %321 = math.tanh %320 : vector<2x32xf32>
    %322 = vector.extract_strided_slice %304 {offsets = [0, 96], sizes = [2, 32], strides = [1, 1]} : vector<2x128xf32> to vector<2x32xf32>
    %323 = arith.negf %322 : vector<2x32xf32>
    %324 = math.exp %323 : vector<2x32xf32>
    %cst_68 = arith.constant 1.000000e+00 : f32
    %325 = vector.broadcast %cst_68 : f32 to vector<2x32xf32>
    %326 = arith.addf %325, %324 : vector<2x32xf32>
    %327 = arith.divf %325, %326 : vector<2x32xf32>
    %328 = arith.mulf %319, %272 : vector<2x32xf32>
    %329 = arith.mulf %313, %321 : vector<2x32xf32>
    %330 = arith.addf %328, %329 : vector<2x32xf32>
    %331 = math.tanh %330 : vector<2x32xf32>
    %332 = arith.mulf %327, %331 : vector<2x32xf32>
    %333 = vector.extract_strided_slice %307 {offsets = [0, 0], sizes = [2, 32], strides = [1, 1]} : vector<2x128xf32> to vector<2x32xf32>
    %334 = arith.negf %333 : vector<2x32xf32>
    %335 = math.exp %334 : vector<2x32xf32>
    %cst_69 = arith.constant 1.000000e+00 : f32
    %336 = vector.broadcast %cst_69 : f32 to vector<2x32xf32>
    %337 = arith.addf %336, %335 : vector<2x32xf32>
    %338 = arith.divf %336, %337 : vector<2x32xf32>
    %339 = vector.extract_strided_slice %307 {offsets = [0, 32], sizes = [2, 32], strides = [1, 1]} : vector<2x128xf32> to vector<2x32xf32>
    %340 = arith.negf %339 : vector<2x32xf32>
    %341 = math.exp %340 : vector<2x32xf32>
    %cst_70 = arith.constant 1.000000e+00 : f32
    %342 = vector.broadcast %cst_70 : f32 to vector<2x32xf32>
    %343 = arith.addf %342, %341 : vector<2x32xf32>
    %344 = arith.divf %342, %343 : vector<2x32xf32>
    %345 = vector.extract_strided_slice %307 {offsets = [0, 64], sizes = [2, 32], strides = [1, 1]} : vector<2x128xf32> to vector<2x32xf32>
    %346 = math.tanh %345 : vector<2x32xf32>
    %347 = vector.extract_strided_slice %307 {offsets = [0, 96], sizes = [2, 32], strides = [1, 1]} : vector<2x128xf32> to vector<2x32xf32>
    %348 = arith.negf %347 : vector<2x32xf32>
    %349 = math.exp %348 : vector<2x32xf32>
    %cst_71 = arith.constant 1.000000e+00 : f32
    %350 = vector.broadcast %cst_71 : f32 to vector<2x32xf32>
    %351 = arith.addf %350, %349 : vector<2x32xf32>
    %352 = arith.divf %350, %351 : vector<2x32xf32>
    %353 = arith.mulf %344, %297 : vector<2x32xf32>
    %354 = arith.mulf %338, %346 : vector<2x32xf32>
    %355 = arith.addf %353, %354 : vector<2x32xf32>
    %356 = math.tanh %355 : vector<2x32xf32>
    %357 = arith.mulf %352, %356 : vector<2x32xf32>
    %c10_72 = arith.constant 10 : index
    %c0_73 = arith.constant 0 : index
    %358 = vector.load %arg11[%c10_72, %c0_73] : memref<16x64xf32, #tpu.memory_space<vmem>>, vector<2x32xf32>
    tpu.vector_store %arg11[%c10_72, %c0_73], %332 {strides = array<i32>} : memref<16x64xf32, #tpu.memory_space<vmem>>, vector<2x32xf32>,
    %c4_74 = arith.constant 4 : index
    %c32_75 = arith.constant 32 : index
    %359 = vector.load %arg11[%c4_74, %c32_75] : memref<16x64xf32, #tpu.memory_space<vmem>>, vector<2x32xf32>
    tpu.vector_store %arg11[%c4_74, %c32_75], %357 {strides = array<i32>} : memref<16x64xf32, #tpu.memory_space<vmem>>, vector<2x32xf32>,
    %360 = vector.extract_strided_slice %9 {offsets = [12, 0], sizes = [2, 128], strides = [1, 1]} : vector<16x128xf32> to vector<2x128xf32>
    %cst_76 = arith.constant dense<0.000000e+00> : vector<2x128xf32>
    %361 = tpu.matmul %332, %0, %cst_76 {dimension_numbers = #tpu.dot_dimension_numbers<[1], [0], [0], [1], [0, 0, 1, 1], [], []>} : vector<2x32xf32>, vector<32x128xf32>, vector<2x128xf32> -> vector<2x128xf32>
    %362 = arith.addf %360, %361 : vector<2x128xf32>
    %363 = vector.extract_strided_slice %10 {offsets = [2, 0], sizes = [2, 128], strides = [1, 1]} : vector<16x128xf32> to vector<2x128xf32>
    %cst_77 = arith.constant dense<0.000000e+00> : vector<2x128xf32>
    %364 = tpu.matmul %357, %1, %cst_77 {dimension_numbers = #tpu.dot_dimension_numbers<[1], [0], [0], [1], [0, 0, 1, 1], [], []>} : vector<2x32xf32>, vector<32x128xf32>, vector<2x128xf32> -> vector<2x128xf32>
    %365 = arith.addf %363, %364 : vector<2x128xf32>
    %366 = vector.extract_strided_slice %362 {offsets = [0, 0], sizes = [2, 32], strides = [1, 1]} : vector<2x128xf32> to vector<2x32xf32>
    %367 = arith.negf %366 : vector<2x32xf32>
    %368 = math.exp %367 : vector<2x32xf32>
    %cst_78 = arith.constant 1.000000e+00 : f32
    %369 = vector.broadcast %cst_78 : f32 to vector<2x32xf32>
    %370 = arith.addf %369, %368 : vector<2x32xf32>
    %371 = arith.divf %369, %370 : vector<2x32xf32>
    %372 = vector.extract_strided_slice %362 {offsets = [0, 32], sizes = [2, 32], strides = [1, 1]} : vector<2x128xf32> to vector<2x32xf32>
    %373 = arith.negf %372 : vector<2x32xf32>
    %374 = math.exp %373 : vector<2x32xf32>
    %cst_79 = arith.constant 1.000000e+00 : f32
    %375 = vector.broadcast %cst_79 : f32 to vector<2x32xf32>
    %376 = arith.addf %375, %374 : vector<2x32xf32>
    %377 = arith.divf %375, %376 : vector<2x32xf32>
    %378 = vector.extract_strided_slice %362 {offsets = [0, 64], sizes = [2, 32], strides = [1, 1]} : vector<2x128xf32> to vector<2x32xf32>
    %379 = math.tanh %378 : vector<2x32xf32>
    %380 = vector.extract_strided_slice %362 {offsets = [0, 96], sizes = [2, 32], strides = [1, 1]} : vector<2x128xf32> to vector<2x32xf32>
    %381 = arith.negf %380 : vector<2x32xf32>
    %382 = math.exp %381 : vector<2x32xf32>
    %cst_80 = arith.constant 1.000000e+00 : f32
    %383 = vector.broadcast %cst_80 : f32 to vector<2x32xf32>
    %384 = arith.addf %383, %382 : vector<2x32xf32>
    %385 = arith.divf %383, %384 : vector<2x32xf32>
    %386 = arith.mulf %377, %330 : vector<2x32xf32>
    %387 = arith.mulf %371, %379 : vector<2x32xf32>
    %388 = arith.addf %386, %387 : vector<2x32xf32>
    %389 = math.tanh %388 : vector<2x32xf32>
    %390 = arith.mulf %385, %389 : vector<2x32xf32>
    %391 = vector.extract_strided_slice %365 {offsets = [0, 0], sizes = [2, 32], strides = [1, 1]} : vector<2x128xf32> to vector<2x32xf32>
    %392 = arith.negf %391 : vector<2x32xf32>
    %393 = math.exp %392 : vector<2x32xf32>
    %cst_81 = arith.constant 1.000000e+00 : f32
    %394 = vector.broadcast %cst_81 : f32 to vector<2x32xf32>
    %395 = arith.addf %394, %393 : vector<2x32xf32>
    %396 = arith.divf %394, %395 : vector<2x32xf32>
    %397 = vector.extract_strided_slice %365 {offsets = [0, 32], sizes = [2, 32], strides = [1, 1]} : vector<2x128xf32> to vector<2x32xf32>
    %398 = arith.negf %397 : vector<2x32xf32>
    %399 = math.exp %398 : vector<2x32xf32>
    %cst_82 = arith.constant 1.000000e+00 : f32
    %400 = vector.broadcast %cst_82 : f32 to vector<2x32xf32>
    %401 = arith.addf %400, %399 : vector<2x32xf32>
    %402 = arith.divf %400, %401 : vector<2x32xf32>
    %403 = vector.extract_strided_slice %365 {offsets = [0, 64], sizes = [2, 32], strides = [1, 1]} : vector<2x128xf32> to vector<2x32xf32>
    %404 = math.tanh %403 : vector<2x32xf32>
    %405 = vector.extract_strided_slice %365 {offsets = [0, 96], sizes = [2, 32], strides = [1, 1]} : vector<2x128xf32> to vector<2x32xf32>
    %406 = arith.negf %405 : vector<2x32xf32>
    %407 = math.exp %406 : vector<2x32xf32>
    %cst_83 = arith.constant 1.000000e+00 : f32
    %408 = vector.broadcast %cst_83 : f32 to vector<2x32xf32>
    %409 = arith.addf %408, %407 : vector<2x32xf32>
    %410 = arith.divf %408, %409 : vector<2x32xf32>
    %411 = arith.mulf %402, %355 : vector<2x32xf32>
    %412 = arith.mulf %396, %404 : vector<2x32xf32>
    %413 = arith.addf %411, %412 : vector<2x32xf32>
    %414 = math.tanh %413 : vector<2x32xf32>
    %415 = arith.mulf %410, %414 : vector<2x32xf32>
    %c12_84 = arith.constant 12 : index
    %c0_85 = arith.constant 0 : index
    %416 = vector.load %arg11[%c12_84, %c0_85] : memref<16x64xf32, #tpu.memory_space<vmem>>, vector<2x32xf32>
    tpu.vector_store %arg11[%c12_84, %c0_85], %390 {strides = array<i32>} : memref<16x64xf32, #tpu.memory_space<vmem>>, vector<2x32xf32>,
    %c2_86 = arith.constant 2 : index
    %c32_87 = arith.constant 32 : index
    %417 = vector.load %arg11[%c2_86, %c32_87] : memref<16x64xf32, #tpu.memory_space<vmem>>, vector<2x32xf32>
    tpu.vector_store %arg11[%c2_86, %c32_87], %415 {strides = array<i32>} : memref<16x64xf32, #tpu.memory_space<vmem>>, vector<2x32xf32>,
    %418 = vector.extract_strided_slice %9 {offsets = [14, 0], sizes = [2, 128], strides = [1, 1]} : vector<16x128xf32> to vector<2x128xf32>
    %cst_88 = arith.constant dense<0.000000e+00> : vector<2x128xf32>
    %419 = tpu.matmul %390, %0, %cst_88 {dimension_numbers = #tpu.dot_dimension_numbers<[1], [0], [0], [1], [0, 0, 1, 1], [], []>} : vector<2x32xf32>, vector<32x128xf32>, vector<2x128xf32> -> vector<2x128xf32>
    %420 = arith.addf %418, %419 : vector<2x128xf32>
    %421 = vector.extract_strided_slice %10 {offsets = [0, 0], sizes = [2, 128], strides = [1, 1]} : vector<16x128xf32> to vector<2x128xf32>
    %cst_89 = arith.constant dense<0.000000e+00> : vector<2x128xf32>
    %422 = tpu.matmul %415, %1, %cst_89 {dimension_numbers = #tpu.dot_dimension_numbers<[1], [0], [0], [1], [0, 0, 1, 1], [], []>} : vector<2x32xf32>, vector<32x128xf32>, vector<2x128xf32> -> vector<2x128xf32>
    %423 = arith.addf %421, %422 : vector<2x128xf32>
    %424 = vector.extract_strided_slice %420 {offsets = [0, 0], sizes = [2, 32], strides = [1, 1]} : vector<2x128xf32> to vector<2x32xf32>
    %425 = arith.negf %424 : vector<2x32xf32>
    %426 = math.exp %425 : vector<2x32xf32>
    %cst_90 = arith.constant 1.000000e+00 : f32
    %427 = vector.broadcast %cst_90 : f32 to vector<2x32xf32>
    %428 = arith.addf %427, %426 : vector<2x32xf32>
    %429 = arith.divf %427, %428 : vector<2x32xf32>
    %430 = vector.extract_strided_slice %420 {offsets = [0, 32], sizes = [2, 32], strides = [1, 1]} : vector<2x128xf32> to vector<2x32xf32>
    %431 = arith.negf %430 : vector<2x32xf32>
    %432 = math.exp %431 : vector<2x32xf32>
    %cst_91 = arith.constant 1.000000e+00 : f32
    %433 = vector.broadcast %cst_91 : f32 to vector<2x32xf32>
    %434 = arith.addf %433, %432 : vector<2x32xf32>
    %435 = arith.divf %433, %434 : vector<2x32xf32>
    %436 = vector.extract_strided_slice %420 {offsets = [0, 64], sizes = [2, 32], strides = [1, 1]} : vector<2x128xf32> to vector<2x32xf32>
    %437 = math.tanh %436 : vector<2x32xf32>
    %438 = vector.extract_strided_slice %420 {offsets = [0, 96], sizes = [2, 32], strides = [1, 1]} : vector<2x128xf32> to vector<2x32xf32>
    %439 = arith.negf %438 : vector<2x32xf32>
    %440 = math.exp %439 : vector<2x32xf32>
    %cst_92 = arith.constant 1.000000e+00 : f32
    %441 = vector.broadcast %cst_92 : f32 to vector<2x32xf32>
    %442 = arith.addf %441, %440 : vector<2x32xf32>
    %443 = arith.divf %441, %442 : vector<2x32xf32>
    %444 = arith.mulf %435, %388 : vector<2x32xf32>
    %445 = arith.mulf %429, %437 : vector<2x32xf32>
    %446 = arith.addf %444, %445 : vector<2x32xf32>
    %447 = math.tanh %446 : vector<2x32xf32>
    %448 = arith.mulf %443, %447 : vector<2x32xf32>
    %449 = vector.extract_strided_slice %423 {offsets = [0, 0], sizes = [2, 32], strides = [1, 1]} : vector<2x128xf32> to vector<2x32xf32>
    %450 = arith.negf %449 : vector<2x32xf32>
    %451 = math.exp %450 : vector<2x32xf32>
    %cst_93 = arith.constant 1.000000e+00 : f32
    %452 = vector.broadcast %cst_93 : f32 to vector<2x32xf32>
    %453 = arith.addf %452, %451 : vector<2x32xf32>
    %454 = arith.divf %452, %453 : vector<2x32xf32>
    %455 = vector.extract_strided_slice %423 {offsets = [0, 32], sizes = [2, 32], strides = [1, 1]} : vector<2x128xf32> to vector<2x32xf32>
    %456 = arith.negf %455 : vector<2x32xf32>
    %457 = math.exp %456 : vector<2x32xf32>
    %cst_94 = arith.constant 1.000000e+00 : f32
    %458 = vector.broadcast %cst_94 : f32 to vector<2x32xf32>
    %459 = arith.addf %458, %457 : vector<2x32xf32>
    %460 = arith.divf %458, %459 : vector<2x32xf32>
    %461 = vector.extract_strided_slice %423 {offsets = [0, 64], sizes = [2, 32], strides = [1, 1]} : vector<2x128xf32> to vector<2x32xf32>
    %462 = math.tanh %461 : vector<2x32xf32>
    %463 = vector.extract_strided_slice %423 {offsets = [0, 96], sizes = [2, 32], strides = [1, 1]} : vector<2x128xf32> to vector<2x32xf32>
    %464 = arith.negf %463 : vector<2x32xf32>
    %465 = math.exp %464 : vector<2x32xf32>
    %cst_95 = arith.constant 1.000000e+00 : f32
    %466 = vector.broadcast %cst_95 : f32 to vector<2x32xf32>
    %467 = arith.addf %466, %465 : vector<2x32xf32>
    %468 = arith.divf %466, %467 : vector<2x32xf32>
    %469 = arith.mulf %460, %413 : vector<2x32xf32>
    %470 = arith.mulf %454, %462 : vector<2x32xf32>
    %471 = arith.addf %469, %470 : vector<2x32xf32>
    %472 = math.tanh %471 : vector<2x32xf32>
    %473 = arith.mulf %468, %472 : vector<2x32xf32>
    %c14_96 = arith.constant 14 : index
    %c0_97 = arith.constant 0 : index
    %474 = vector.load %arg11[%c14_96, %c0_97] : memref<16x64xf32, #tpu.memory_space<vmem>>, vector<2x32xf32>
    tpu.vector_store %arg11[%c14_96, %c0_97], %448 {strides = array<i32>} : memref<16x64xf32, #tpu.memory_space<vmem>>, vector<2x32xf32>,
    %c0_98 = arith.constant 0 : index
    %c32_99 = arith.constant 32 : index
    %475 = vector.load %arg11[%c0_98, %c32_99] : memref<16x64xf32, #tpu.memory_space<vmem>>, vector<2x32xf32>
    tpu.vector_store %arg11[%c0_98, %c32_99], %473 {strides = array<i32>} : memref<16x64xf32, #tpu.memory_space<vmem>>, vector<2x32xf32>,
    %c0_100 = arith.constant 0 : index
    %c0_101 = arith.constant 0 : index
    %476 = vector.load %arg11[%c0_100, %c0_101] : memref<16x64xf32, #tpu.memory_space<vmem>>, vector<16x64xf32>
    %c0_102 = arith.constant 0 : index
    %c0_103 = arith.constant 0 : index
    %477 = vector.load %arg5[%c0_102, %c0_103] : memref<64x128xf32, #tpu.memory_space<vmem>>, vector<64x128xf32>
    %cst_104 = arith.constant dense<0.000000e+00> : vector<16x128xf32>
    %478 = tpu.matmul %476, %477, %cst_104 {dimension_numbers = #tpu.dot_dimension_numbers<[1], [0], [0], [1], [0, 0, 1, 1], [], []>} : vector<16x64xf32>, vector<64x128xf32>, vector<16x128xf32> -> vector<16x128xf32>
    %c0_105 = arith.constant 0 : index
    %c0_106 = arith.constant 0 : index
    %479 = vector.load %arg7[%c0_105, %c0_106] : memref<1x128xf32, #tpu.memory_space<vmem>>, vector<1x128xf32>
    %480 = vector.broadcast %479 : vector<1x128xf32> to vector<16x128xf32>
    %481 = arith.addf %478, %480 : vector<16x128xf32>
    %482 = vector.extract_strided_slice %481 {offsets = [14, 0], sizes = [2, 128], strides = [1, 1]} : vector<16x128xf32> to vector<2x128xf32>
    %cst_107 = arith.constant dense<0.000000e+00> : vector<2x128xf32>
    %483 = tpu.matmul %11, %2, %cst_107 {dimension_numbers = #tpu.dot_dimension_numbers<[1], [0], [0], [1], [0, 0, 1, 1], [], []>} : vector<2x32xf32>, vector<32x128xf32>, vector<2x128xf32> -> vector<2x128xf32>
    %484 = arith.addf %482, %483 : vector<2x128xf32>
    %485 = vector.extract_strided_slice %484 {offsets = [0, 0], sizes = [2, 32], strides = [1, 1]} : vector<2x128xf32> to vector<2x32xf32>
    %486 = arith.negf %485 : vector<2x32xf32>
    %487 = math.exp %486 : vector<2x32xf32>
    %cst_108 = arith.constant 1.000000e+00 : f32
    %488 = vector.broadcast %cst_108 : f32 to vector<2x32xf32>
    %489 = arith.addf %488, %487 : vector<2x32xf32>
    %490 = arith.divf %488, %489 : vector<2x32xf32>
    %491 = vector.extract_strided_slice %484 {offsets = [0, 32], sizes = [2, 32], strides = [1, 1]} : vector<2x128xf32> to vector<2x32xf32>
    %492 = arith.negf %491 : vector<2x32xf32>
    %493 = math.exp %492 : vector<2x32xf32>
    %cst_109 = arith.constant 1.000000e+00 : f32
    %494 = vector.broadcast %cst_109 : f32 to vector<2x32xf32>
    %495 = arith.addf %494, %493 : vector<2x32xf32>
    %496 = arith.divf %494, %495 : vector<2x32xf32>
    %497 = vector.extract_strided_slice %484 {offsets = [0, 64], sizes = [2, 32], strides = [1, 1]} : vector<2x128xf32> to vector<2x32xf32>
    %498 = math.tanh %497 : vector<2x32xf32>
    %499 = vector.extract_strided_slice %484 {offsets = [0, 96], sizes = [2, 32], strides = [1, 1]} : vector<2x128xf32> to vector<2x32xf32>
    %500 = arith.negf %499 : vector<2x32xf32>
    %501 = math.exp %500 : vector<2x32xf32>
    %cst_110 = arith.constant 1.000000e+00 : f32
    %502 = vector.broadcast %cst_110 : f32 to vector<2x32xf32>
    %503 = arith.addf %502, %501 : vector<2x32xf32>
    %504 = arith.divf %502, %503 : vector<2x32xf32>
    %505 = arith.mulf %496, %11 : vector<2x32xf32>
    %506 = arith.mulf %490, %498 : vector<2x32xf32>
    %507 = arith.addf %505, %506 : vector<2x32xf32>
    %508 = math.tanh %507 : vector<2x32xf32>
    %509 = arith.mulf %504, %508 : vector<2x32xf32>
    %510 = vector.extract_strided_slice %481 {offsets = [12, 0], sizes = [2, 128], strides = [1, 1]} : vector<16x128xf32> to vector<2x128xf32>
    %cst_111 = arith.constant dense<0.000000e+00> : vector<2x128xf32>
    %511 = tpu.matmul %509, %2, %cst_111 {dimension_numbers = #tpu.dot_dimension_numbers<[1], [0], [0], [1], [0, 0, 1, 1], [], []>} : vector<2x32xf32>, vector<32x128xf32>, vector<2x128xf32> -> vector<2x128xf32>
    %512 = arith.addf %510, %511 : vector<2x128xf32>
    %513 = vector.extract_strided_slice %512 {offsets = [0, 0], sizes = [2, 32], strides = [1, 1]} : vector<2x128xf32> to vector<2x32xf32>
    %514 = arith.negf %513 : vector<2x32xf32>
    %515 = math.exp %514 : vector<2x32xf32>
    %cst_112 = arith.constant 1.000000e+00 : f32
    %516 = vector.broadcast %cst_112 : f32 to vector<2x32xf32>
    %517 = arith.addf %516, %515 : vector<2x32xf32>
    %518 = arith.divf %516, %517 : vector<2x32xf32>
    %519 = vector.extract_strided_slice %512 {offsets = [0, 32], sizes = [2, 32], strides = [1, 1]} : vector<2x128xf32> to vector<2x32xf32>
    %520 = arith.negf %519 : vector<2x32xf32>
    %521 = math.exp %520 : vector<2x32xf32>
    %cst_113 = arith.constant 1.000000e+00 : f32
    %522 = vector.broadcast %cst_113 : f32 to vector<2x32xf32>
    %523 = arith.addf %522, %521 : vector<2x32xf32>
    %524 = arith.divf %522, %523 : vector<2x32xf32>
    %525 = vector.extract_strided_slice %512 {offsets = [0, 64], sizes = [2, 32], strides = [1, 1]} : vector<2x128xf32> to vector<2x32xf32>
    %526 = math.tanh %525 : vector<2x32xf32>
    %527 = vector.extract_strided_slice %512 {offsets = [0, 96], sizes = [2, 32], strides = [1, 1]} : vector<2x128xf32> to vector<2x32xf32>
    %528 = arith.negf %527 : vector<2x32xf32>
    %529 = math.exp %528 : vector<2x32xf32>
    %cst_114 = arith.constant 1.000000e+00 : f32
    %530 = vector.broadcast %cst_114 : f32 to vector<2x32xf32>
    %531 = arith.addf %530, %529 : vector<2x32xf32>
    %532 = arith.divf %530, %531 : vector<2x32xf32>
    %533 = arith.mulf %524, %507 : vector<2x32xf32>
    %534 = arith.mulf %518, %526 : vector<2x32xf32>
    %535 = arith.addf %533, %534 : vector<2x32xf32>
    %536 = math.tanh %535 : vector<2x32xf32>
    %537 = arith.mulf %532, %536 : vector<2x32xf32>
    %538 = vector.extract_strided_slice %481 {offsets = [10, 0], sizes = [2, 128], strides = [1, 1]} : vector<16x128xf32> to vector<2x128xf32>
    %cst_115 = arith.constant dense<0.000000e+00> : vector<2x128xf32>
    %539 = tpu.matmul %537, %2, %cst_115 {dimension_numbers = #tpu.dot_dimension_numbers<[1], [0], [0], [1], [0, 0, 1, 1], [], []>} : vector<2x32xf32>, vector<32x128xf32>, vector<2x128xf32> -> vector<2x128xf32>
    %540 = arith.addf %538, %539 : vector<2x128xf32>
    %541 = vector.extract_strided_slice %540 {offsets = [0, 0], sizes = [2, 32], strides = [1, 1]} : vector<2x128xf32> to vector<2x32xf32>
    %542 = arith.negf %541 : vector<2x32xf32>
    %543 = math.exp %542 : vector<2x32xf32>
    %cst_116 = arith.constant 1.000000e+00 : f32
    %544 = vector.broadcast %cst_116 : f32 to vector<2x32xf32>
    %545 = arith.addf %544, %543 : vector<2x32xf32>
    %546 = arith.divf %544, %545 : vector<2x32xf32>
    %547 = vector.extract_strided_slice %540 {offsets = [0, 32], sizes = [2, 32], strides = [1, 1]} : vector<2x128xf32> to vector<2x32xf32>
    %548 = arith.negf %547 : vector<2x32xf32>
    %549 = math.exp %548 : vector<2x32xf32>
    %cst_117 = arith.constant 1.000000e+00 : f32
    %550 = vector.broadcast %cst_117 : f32 to vector<2x32xf32>
    %551 = arith.addf %550, %549 : vector<2x32xf32>
    %552 = arith.divf %550, %551 : vector<2x32xf32>
    %553 = vector.extract_strided_slice %540 {offsets = [0, 64], sizes = [2, 32], strides = [1, 1]} : vector<2x128xf32> to vector<2x32xf32>
    %554 = math.tanh %553 : vector<2x32xf32>
    %555 = vector.extract_strided_slice %540 {offsets = [0, 96], sizes = [2, 32], strides = [1, 1]} : vector<2x128xf32> to vector<2x32xf32>
    %556 = arith.negf %555 : vector<2x32xf32>
    %557 = math.exp %556 : vector<2x32xf32>
    %cst_118 = arith.constant 1.000000e+00 : f32
    %558 = vector.broadcast %cst_118 : f32 to vector<2x32xf32>
    %559 = arith.addf %558, %557 : vector<2x32xf32>
    %560 = arith.divf %558, %559 : vector<2x32xf32>
    %561 = arith.mulf %552, %535 : vector<2x32xf32>
    %562 = arith.mulf %546, %554 : vector<2x32xf32>
    %563 = arith.addf %561, %562 : vector<2x32xf32>
    %564 = math.tanh %563 : vector<2x32xf32>
    %565 = arith.mulf %560, %564 : vector<2x32xf32>
    %566 = vector.extract_strided_slice %481 {offsets = [8, 0], sizes = [2, 128], strides = [1, 1]} : vector<16x128xf32> to vector<2x128xf32>
    %cst_119 = arith.constant dense<0.000000e+00> : vector<2x128xf32>
    %567 = tpu.matmul %565, %2, %cst_119 {dimension_numbers = #tpu.dot_dimension_numbers<[1], [0], [0], [1], [0, 0, 1, 1], [], []>} : vector<2x32xf32>, vector<32x128xf32>, vector<2x128xf32> -> vector<2x128xf32>
    %568 = arith.addf %566, %567 : vector<2x128xf32>
    %569 = vector.extract_strided_slice %568 {offsets = [0, 0], sizes = [2, 32], strides = [1, 1]} : vector<2x128xf32> to vector<2x32xf32>
    %570 = arith.negf %569 : vector<2x32xf32>
    %571 = math.exp %570 : vector<2x32xf32>
    %cst_120 = arith.constant 1.000000e+00 : f32
    %572 = vector.broadcast %cst_120 : f32 to vector<2x32xf32>
    %573 = arith.addf %572, %571 : vector<2x32xf32>
    %574 = arith.divf %572, %573 : vector<2x32xf32>
    %575 = vector.extract_strided_slice %568 {offsets = [0, 32], sizes = [2, 32], strides = [1, 1]} : vector<2x128xf32> to vector<2x32xf32>
    %576 = arith.negf %575 : vector<2x32xf32>
    %577 = math.exp %576 : vector<2x32xf32>
    %cst_121 = arith.constant 1.000000e+00 : f32
    %578 = vector.broadcast %cst_121 : f32 to vector<2x32xf32>
    %579 = arith.addf %578, %577 : vector<2x32xf32>
    %580 = arith.divf %578, %579 : vector<2x32xf32>
    %581 = vector.extract_strided_slice %568 {offsets = [0, 64], sizes = [2, 32], strides = [1, 1]} : vector<2x128xf32> to vector<2x32xf32>
    %582 = math.tanh %581 : vector<2x32xf32>
    %583 = vector.extract_strided_slice %568 {offsets = [0, 96], sizes = [2, 32], strides = [1, 1]} : vector<2x128xf32> to vector<2x32xf32>
    %584 = arith.negf %583 : vector<2x32xf32>
    %585 = math.exp %584 : vector<2x32xf32>
    %cst_122 = arith.constant 1.000000e+00 : f32
    %586 = vector.broadcast %cst_122 : f32 to vector<2x32xf32>
    %587 = arith.addf %586, %585 : vector<2x32xf32>
    %588 = arith.divf %586, %587 : vector<2x32xf32>
    %589 = arith.mulf %580, %563 : vector<2x32xf32>
    %590 = arith.mulf %574, %582 : vector<2x32xf32>
    %591 = arith.addf %589, %590 : vector<2x32xf32>
    %592 = math.tanh %591 : vector<2x32xf32>
    %593 = arith.mulf %588, %592 : vector<2x32xf32>
    %594 = vector.extract_strided_slice %481 {offsets = [6, 0], sizes = [2, 128], strides = [1, 1]} : vector<16x128xf32> to vector<2x128xf32>
    %cst_123 = arith.constant dense<0.000000e+00> : vector<2x128xf32>
    %595 = tpu.matmul %593, %2, %cst_123 {dimension_numbers = #tpu.dot_dimension_numbers<[1], [0], [0], [1], [0, 0, 1, 1], [], []>} : vector<2x32xf32>, vector<32x128xf32>, vector<2x128xf32> -> vector<2x128xf32>
    %596 = arith.addf %594, %595 : vector<2x128xf32>
    %597 = vector.extract_strided_slice %596 {offsets = [0, 0], sizes = [2, 32], strides = [1, 1]} : vector<2x128xf32> to vector<2x32xf32>
    %598 = arith.negf %597 : vector<2x32xf32>
    %599 = math.exp %598 : vector<2x32xf32>
    %cst_124 = arith.constant 1.000000e+00 : f32
    %600 = vector.broadcast %cst_124 : f32 to vector<2x32xf32>
    %601 = arith.addf %600, %599 : vector<2x32xf32>
    %602 = arith.divf %600, %601 : vector<2x32xf32>
    %603 = vector.extract_strided_slice %596 {offsets = [0, 32], sizes = [2, 32], strides = [1, 1]} : vector<2x128xf32> to vector<2x32xf32>
    %604 = arith.negf %603 : vector<2x32xf32>
    %605 = math.exp %604 : vector<2x32xf32>
    %cst_125 = arith.constant 1.000000e+00 : f32
    %606 = vector.broadcast %cst_125 : f32 to vector<2x32xf32>
    %607 = arith.addf %606, %605 : vector<2x32xf32>
    %608 = arith.divf %606, %607 : vector<2x32xf32>
    %609 = vector.extract_strided_slice %596 {offsets = [0, 64], sizes = [2, 32], strides = [1, 1]} : vector<2x128xf32> to vector<2x32xf32>
    %610 = math.tanh %609 : vector<2x32xf32>
    %611 = vector.extract_strided_slice %596 {offsets = [0, 96], sizes = [2, 32], strides = [1, 1]} : vector<2x128xf32> to vector<2x32xf32>
    %612 = arith.negf %611 : vector<2x32xf32>
    %613 = math.exp %612 : vector<2x32xf32>
    %cst_126 = arith.constant 1.000000e+00 : f32
    %614 = vector.broadcast %cst_126 : f32 to vector<2x32xf32>
    %615 = arith.addf %614, %613 : vector<2x32xf32>
    %616 = arith.divf %614, %615 : vector<2x32xf32>
    %617 = arith.mulf %608, %591 : vector<2x32xf32>
    %618 = arith.mulf %602, %610 : vector<2x32xf32>
    %619 = arith.addf %617, %618 : vector<2x32xf32>
    %620 = math.tanh %619 : vector<2x32xf32>
    %621 = arith.mulf %616, %620 : vector<2x32xf32>
    %622 = vector.extract_strided_slice %481 {offsets = [4, 0], sizes = [2, 128], strides = [1, 1]} : vector<16x128xf32> to vector<2x128xf32>
    %cst_127 = arith.constant dense<0.000000e+00> : vector<2x128xf32>
    %623 = tpu.matmul %621, %2, %cst_127 {dimension_numbers = #tpu.dot_dimension_numbers<[1], [0], [0], [1], [0, 0, 1, 1], [], []>} : vector<2x32xf32>, vector<32x128xf32>, vector<2x128xf32> -> vector<2x128xf32>
    %624 = arith.addf %622, %623 : vector<2x128xf32>
    %625 = vector.extract_strided_slice %624 {offsets = [0, 0], sizes = [2, 32], strides = [1, 1]} : vector<2x128xf32> to vector<2x32xf32>
    %626 = arith.negf %625 : vector<2x32xf32>
    %627 = math.exp %626 : vector<2x32xf32>
    %cst_128 = arith.constant 1.000000e+00 : f32
    %628 = vector.broadcast %cst_128 : f32 to vector<2x32xf32>
    %629 = arith.addf %628, %627 : vector<2x32xf32>
    %630 = arith.divf %628, %629 : vector<2x32xf32>
    %631 = vector.extract_strided_slice %624 {offsets = [0, 32], sizes = [2, 32], strides = [1, 1]} : vector<2x128xf32> to vector<2x32xf32>
    %632 = arith.negf %631 : vector<2x32xf32>
    %633 = math.exp %632 : vector<2x32xf32>
    %cst_129 = arith.constant 1.000000e+00 : f32
    %634 = vector.broadcast %cst_129 : f32 to vector<2x32xf32>
    %635 = arith.addf %634, %633 : vector<2x32xf32>
    %636 = arith.divf %634, %635 : vector<2x32xf32>
    %637 = vector.extract_strided_slice %624 {offsets = [0, 64], sizes = [2, 32], strides = [1, 1]} : vector<2x128xf32> to vector<2x32xf32>
    %638 = math.tanh %637 : vector<2x32xf32>
    %639 = vector.extract_strided_slice %624 {offsets = [0, 96], sizes = [2, 32], strides = [1, 1]} : vector<2x128xf32> to vector<2x32xf32>
    %640 = arith.negf %639 : vector<2x32xf32>
    %641 = math.exp %640 : vector<2x32xf32>
    %cst_130 = arith.constant 1.000000e+00 : f32
    %642 = vector.broadcast %cst_130 : f32 to vector<2x32xf32>
    %643 = arith.addf %642, %641 : vector<2x32xf32>
    %644 = arith.divf %642, %643 : vector<2x32xf32>
    %645 = arith.mulf %636, %619 : vector<2x32xf32>
    %646 = arith.mulf %630, %638 : vector<2x32xf32>
    %647 = arith.addf %645, %646 : vector<2x32xf32>
    %648 = math.tanh %647 : vector<2x32xf32>
    %649 = arith.mulf %644, %648 : vector<2x32xf32>
    %650 = vector.extract_strided_slice %481 {offsets = [2, 0], sizes = [2, 128], strides = [1, 1]} : vector<16x128xf32> to vector<2x128xf32>
    %cst_131 = arith.constant dense<0.000000e+00> : vector<2x128xf32>
    %651 = tpu.matmul %649, %2, %cst_131 {dimension_numbers = #tpu.dot_dimension_numbers<[1], [0], [0], [1], [0, 0, 1, 1], [], []>} : vector<2x32xf32>, vector<32x128xf32>, vector<2x128xf32> -> vector<2x128xf32>
    %652 = arith.addf %650, %651 : vector<2x128xf32>
    %653 = vector.extract_strided_slice %652 {offsets = [0, 0], sizes = [2, 32], strides = [1, 1]} : vector<2x128xf32> to vector<2x32xf32>
    %654 = arith.negf %653 : vector<2x32xf32>
    %655 = math.exp %654 : vector<2x32xf32>
    %cst_132 = arith.constant 1.000000e+00 : f32
    %656 = vector.broadcast %cst_132 : f32 to vector<2x32xf32>
    %657 = arith.addf %656, %655 : vector<2x32xf32>
    %658 = arith.divf %656, %657 : vector<2x32xf32>
    %659 = vector.extract_strided_slice %652 {offsets = [0, 32], sizes = [2, 32], strides = [1, 1]} : vector<2x128xf32> to vector<2x32xf32>
    %660 = arith.negf %659 : vector<2x32xf32>
    %661 = math.exp %660 : vector<2x32xf32>
    %cst_133 = arith.constant 1.000000e+00 : f32
    %662 = vector.broadcast %cst_133 : f32 to vector<2x32xf32>
    %663 = arith.addf %662, %661 : vector<2x32xf32>
    %664 = arith.divf %662, %663 : vector<2x32xf32>
    %665 = vector.extract_strided_slice %652 {offsets = [0, 64], sizes = [2, 32], strides = [1, 1]} : vector<2x128xf32> to vector<2x32xf32>
    %666 = math.tanh %665 : vector<2x32xf32>
    %667 = vector.extract_strided_slice %652 {offsets = [0, 96], sizes = [2, 32], strides = [1, 1]} : vector<2x128xf32> to vector<2x32xf32>
    %668 = arith.negf %667 : vector<2x32xf32>
    %669 = math.exp %668 : vector<2x32xf32>
    %cst_134 = arith.constant 1.000000e+00 : f32
    %670 = vector.broadcast %cst_134 : f32 to vector<2x32xf32>
    %671 = arith.addf %670, %669 : vector<2x32xf32>
    %672 = arith.divf %670, %671 : vector<2x32xf32>
    %673 = arith.mulf %664, %647 : vector<2x32xf32>
    %674 = arith.mulf %658, %666 : vector<2x32xf32>
    %675 = arith.addf %673, %674 : vector<2x32xf32>
    %676 = math.tanh %675 : vector<2x32xf32>
    %677 = arith.mulf %672, %676 : vector<2x32xf32>
    %678 = vector.extract_strided_slice %481 {offsets = [0, 0], sizes = [2, 128], strides = [1, 1]} : vector<16x128xf32> to vector<2x128xf32>
    %cst_135 = arith.constant dense<0.000000e+00> : vector<2x128xf32>
    %679 = tpu.matmul %677, %2, %cst_135 {dimension_numbers = #tpu.dot_dimension_numbers<[1], [0], [0], [1], [0, 0, 1, 1], [], []>} : vector<2x32xf32>, vector<32x128xf32>, vector<2x128xf32> -> vector<2x128xf32>
    %680 = arith.addf %678, %679 : vector<2x128xf32>
    %681 = vector.extract_strided_slice %680 {offsets = [0, 0], sizes = [2, 32], strides = [1, 1]} : vector<2x128xf32> to vector<2x32xf32>
    %682 = arith.negf %681 : vector<2x32xf32>
    %683 = math.exp %682 : vector<2x32xf32>
    %cst_136 = arith.constant 1.000000e+00 : f32
    %684 = vector.broadcast %cst_136 : f32 to vector<2x32xf32>
    %685 = arith.addf %684, %683 : vector<2x32xf32>
    %686 = arith.divf %684, %685 : vector<2x32xf32>
    %687 = vector.extract_strided_slice %680 {offsets = [0, 32], sizes = [2, 32], strides = [1, 1]} : vector<2x128xf32> to vector<2x32xf32>
    %688 = arith.negf %687 : vector<2x32xf32>
    %689 = math.exp %688 : vector<2x32xf32>
    %cst_137 = arith.constant 1.000000e+00 : f32
    %690 = vector.broadcast %cst_137 : f32 to vector<2x32xf32>
    %691 = arith.addf %690, %689 : vector<2x32xf32>
    %692 = arith.divf %690, %691 : vector<2x32xf32>
    %693 = vector.extract_strided_slice %680 {offsets = [0, 64], sizes = [2, 32], strides = [1, 1]} : vector<2x128xf32> to vector<2x32xf32>
    %694 = math.tanh %693 : vector<2x32xf32>
    %695 = vector.extract_strided_slice %680 {offsets = [0, 96], sizes = [2, 32], strides = [1, 1]} : vector<2x128xf32> to vector<2x32xf32>
    %696 = arith.negf %695 : vector<2x32xf32>
    %697 = math.exp %696 : vector<2x32xf32>
    %cst_138 = arith.constant 1.000000e+00 : f32
    %698 = vector.broadcast %cst_138 : f32 to vector<2x32xf32>
    %699 = arith.addf %698, %697 : vector<2x32xf32>
    %700 = arith.divf %698, %699 : vector<2x32xf32>
    %701 = arith.mulf %692, %675 : vector<2x32xf32>
    %702 = arith.mulf %686, %694 : vector<2x32xf32>
    %703 = arith.addf %701, %702 : vector<2x32xf32>
    %704 = math.tanh %703 : vector<2x32xf32>
    %705 = arith.mulf %700, %704 : vector<2x32xf32>
    %cst_139 = arith.constant 0.000000e+00 : f32
    %706 = vector.broadcast %cst_139 : f32 to vector<2x32xf32>
    %707 = arith.maximumf %705, %706 : vector<2x32xf32>
    %c0_140 = arith.constant 0 : index
    %c0_141 = arith.constant 0 : index
    %708 = vector.load %arg8[%c0_140, %c0_141] : memref<32x10xf32, #tpu.memory_space<vmem>>, vector<32x10xf32>
    %cst_142 = arith.constant dense<0.000000e+00> : vector<2x10xf32>
    %709 = tpu.matmul %707, %708, %cst_142 {dimension_numbers = #tpu.dot_dimension_numbers<[1], [0], [0], [1], [0, 0, 1, 1], [], []>} : vector<2x32xf32>, vector<32x10xf32>, vector<2x10xf32> -> vector<2x10xf32>
    %c0_143 = arith.constant 0 : index
    %c0_144 = arith.constant 0 : index
    %710 = vector.load %arg9[%c0_143, %c0_144] : memref<1x10xf32, #tpu.memory_space<vmem>>, vector<1x10xf32>
    %711 = vector.broadcast %710 : vector<1x10xf32> to vector<2x10xf32>
    %712 = arith.addf %709, %711 : vector<2x10xf32>
    %cst_145 = arith.constant 0.000000e+00 : f32
    %713 = vector.broadcast %cst_145 : f32 to vector<2x10xf32>
    %714 = arith.maximumf %712, %713 : vector<2x10xf32>
    %c0_146 = arith.constant 0 : index
    %c0_147 = arith.constant 0 : index
    %715 = vector.load %arg10[%c0_146, %c0_147] : memref<2x10xf32, #tpu.memory_space<vmem>>, vector<2x10xf32>
    tpu.vector_store %arg10[%c0_146, %c0_147], %714 {strides = array<i32>} : memref<2x10xf32, #tpu.memory_space<vmem>>, vector<2x10xf32>,
    return
  }
}

</mosaic_0001>

<bundles_post_ra>
// kernel: tpu_custom_call.1
= control target key start
LH: loop header
LB: loop body
LE: loop exit
PB: predicated region body
PF: predicated region fallthrough
CT: control target
= control target key end

     0   :  { %15 = vsyncpa [#allocation4], 0  ;;  %s4667_s0 = inlined_call_operand.hbm [shape: f32[16,16], index: 0, kind: input, shape index: {}]   ;;  %s4668_s1 = inlined_call_operand.hbm [shape: f32[16,256], index: 1, kind: input, shape index: {}]   ;;  %s4669_s2 = inlined_call_operand.vmem [shape: f32[1,256], index: 2, kind: input, shape index: {}]   ;;  %s4670_s3 = inlined_call_operand.hbm [shape: f32[32,128], index: 3, kind: input, shape index: {}]   ;;  %s4671_s4 = inlined_call_operand.hbm [shape: f32[32,128], index: 4, kind: input, shape index: {}]   ;;  %s4672_s5 = inlined_call_operand.vmem [shape: f32[64,128], index: 5, kind: input, shape index: {}]   ;;  %s4673_s6 = inlined_call_operand.hbm [shape: f32[32,128], index: 6, kind: input, shape index: {}]   ;;  %s4674_s7 = inlined_call_operand.vmem [shape: f32[1,128], index: 7, kind: input, shape index: {}]   ;;  %s4675_s8 = inlined_call_operand.vmem [shape: f32[32,10], index: 8, kind: input, shape index: {}]   ;;  %s4676_s9 = inlined_call_operand.vmem [shape: f32[1,10], index: 9, kind: input, shape index: {}]   ;;  %s4677_s10 = inlined_call_operand.hbm [shape: f32[2,10], index: 10, kind: output, shape index: {}]  }
   0x1   :  { %16 = vsyncpa [#allocation7], 0 }
   0x2   :  { %17 = vsyncpa [#allocation10], 0 }
   0x3   :  { %18 = vsyncpa [#allocation5], 0  ;;  %s4015_s13 = smov [#allocation6]   ;;  %s3875_s17 = scalar_lea.hbm %s4668_s1, 512 }
   0x4   :  { %s36_s14 = sshll.u32 %s4015_s13, 4  ;;  %p3876_p0 = scmp.ne.s32.totalorder %s4668_s1, %s3875_s17  ;;  %s37_s14 = int_to_ptr.vmem [resolvable:$true] %s36_s14 }
   0x5   :  { %p3879_p1 = scmp.lt.u32.totalorder %s3875_s17, %s4668_s1 }
   0x7   :  { %p3881_p2 = pnand %p3879_p1, %p3876_p0 }
   0x9   :  { %3884 = shalt.err (!%p3881_p2)
}
   0xa   :  { %s3885_s22 = scalar_lea.vmem %s37_s14, 512  ;;  %p3890_p4 = scmp.lt.s32.totalorder %s37_s14, %s37_s14 }
   0xb   :  { %p3886_p3 = scmp.ne.s32.totalorder %s37_s14, %s3885_s22  ;;  %p3891_p5 = scmp.lt.s32.totalorder %s3885_s22, %s3885_s22 }
   0xd   :  { %p3892_p6 = por %p3891_p5, %p3890_p4 }
   0xf   :  { %p3893_p7 = pnand %p3892_p6, %p3886_p3 }
  0x11   :  { %3896 = shalt.err (!%p3893_p7)
}
  0x12   :  { %s4016_s23 = smov 256   ;;  %s4017_s24 = smov 16  }
  0x13   :  { %42 = dma.hbm_to_vmem [thread:$0]  %s4668_s1, 512, %s37_s14, [#allocation7], %s4016_s23, %s4016_s23, %s4017_s24  }
  0x14   :  { %s4018_s27 = smov [#allocation9]   ;;  %s4019_s29 = smov [#allocation3]  }
  0x15   :  { %s62_s28 = sshll.u32 %s4018_s27, 4  ;;  %s24_s30 = sshll.u32 %s4019_s29, 4  ;;  %s63_s28 = int_to_ptr.vmem [resolvable:$true] %s62_s28  ;;  %s25_s30 = int_to_ptr.vmem [resolvable:$true] %s24_s30 }
  0x16   :  { %s3897_s13 = scalar_lea.hbm %s4671_s4, 512 }
  0x17   :  { %p3898_p8 = scmp.ne.s32.totalorder %s4671_s4, %s3897_s13  ;;  %p3901_p9 = scmp.lt.u32.totalorder %s3897_s13, %s4671_s4 }
  0x19   :  { %p3903_p10 = pnand %p3901_p9, %p3898_p8 }
  0x1b   :  { %3906 = shalt.err (!%p3903_p10)
}
  0x1c   :  { %s3907_s1 = scalar_lea.vmem %s63_s28, 512  ;;  %p3912_p12 = scmp.lt.s32.totalorder %s63_s28, %s63_s28 }
  0x1d   :  { %p3908_p11 = scmp.ne.s32.totalorder %s63_s28, %s3907_s1  ;;  %p3913_p13 = scmp.lt.s32.totalorder %s3907_s1, %s3907_s1 }
  0x1f   :  { %p3914_p0 = por %p3913_p13, %p3912_p12 }
  0x21   :  { %p3915_p1 = pnand %p3914_p0, %p3908_p11 }
  0x23   :  { %3918 = shalt.err (!%p3915_p1)
}
  0x24   :  { %s4020_s14 = smov 128   ;;  %s4021_s19 = smov 8  }
  0x25   :  { %68 = dma.hbm_to_vmem [thread:$0]  %s4671_s4, 512, %s63_s28, [#allocation10], %s4020_s14, %s4020_s14, %s4021_s19  }
  0x26   :  { %s3919_s24 = scalar_lea.hbm %s4667_s0, 256 }
  0x27   :  { %p3920_p2 = scmp.ne.s32.totalorder %s4667_s0, %s3919_s24  ;;  %p3923_p3 = scmp.lt.u32.totalorder %s3919_s24, %s4667_s0 }
  0x29   :  { %p3925_p4 = pnand %p3923_p3, %p3920_p2 }
  0x2b   :  { %3928 = shalt.err (!%p3925_p4)
}
  0x2c   :  { %s3929_s11 = scalar_lea.vmem %s25_s30, 256  ;;  %p3934_p6 = scmp.lt.s32.totalorder %s25_s30, %s25_s30 }
  0x2d   :  { %p3930_p5 = scmp.ne.s32.totalorder %s25_s30, %s3929_s11  ;;  %p3935_p7 = scmp.lt.s32.totalorder %s3929_s11, %s3929_s11 }
  0x2f   :  { %p3936_p8 = por %p3935_p7, %p3934_p6 }
  0x31   :  { %p3937_p9 = pnand %p3936_p8, %p3930_p5 }
  0x33   :  { %3940 = shalt.err (!%p3937_p9)
}
  0x34   :  { %30 = dma.hbm_to_vmem [thread:$0]  %s4667_s0, 256, %s25_s30, [#allocation4], %s4020_s14, %s4020_s14, %s4021_s19  }
  0x35   :  { %s4022_s12 = smov [#allocation8]   ;;  %s4023_s15 = smov [#allocation11]  }
  0x36   :  { %s50_s13 = sshll.u32 %s4022_s12, 4  ;;  %s76_s16 = sshll.u32 %s4023_s15, 4  ;;  %s51_s13 = int_to_ptr.vmem [resolvable:$true] %s50_s13  ;;  %s77_s16 = int_to_ptr.vmem [resolvable:$true] %s76_s16 }
  0x37   :  { %s3941_s1 = scalar_lea.hbm %s4670_s3, 512 }
  0x38   :  { %p3942_p10 = scmp.ne.s32.totalorder %s4670_s3, %s3941_s1  ;;  %p3945_p11 = scmp.lt.u32.totalorder %s3941_s1, %s4670_s3 }
  0x3a   :  { %p3947_p12 = pnand %p3945_p11, %p3942_p10 }
  0x3c   :  { %3950 = shalt.err (!%p3947_p12)
}
  0x3d   :  { %s3951_s0 = scalar_lea.vmem %s51_s13, 512  ;;  %p3956_p0 = scmp.lt.s32.totalorder %s51_s13, %s51_s13 }
  0x3e   :  { %p3952_p13 = scmp.ne.s32.totalorder %s51_s13, %s3951_s0  ;;  %p3957_p1 = scmp.lt.s32.totalorder %s3951_s0, %s3951_s0 }
  0x40   :  { %p3958_p2 = por %p3957_p1, %p3956_p0 }
  0x42   :  { %p3959_p3 = pnand %p3958_p2, %p3952_p13 }
  0x44   :  { %3962 = shalt.err (!%p3959_p3)
}
  0x45   :  { %56 = dma.hbm_to_vmem [thread:$0]  %s4670_s3, 512, %s51_s13, [#allocation7], %s4020_s14, %s4020_s14, %s4021_s19  }
  0x46   :  { %s3963_s27 = scalar_lea.hbm %s4673_s6, 512 }
  0x47   :  { %p3964_p4 = scmp.ne.s32.totalorder %s4673_s6, %s3963_s27  ;;  %p3967_p5 = scmp.lt.u32.totalorder %s3963_s27, %s4673_s6 }
  0x49   :  { %p3969_p6 = pnand %p3967_p5, %p3964_p4 }
  0x4b   :  { %3972 = shalt.err (!%p3969_p6)
}
  0x4c   :  { %s3973_s12 = scalar_lea.vmem %s77_s16, 512  ;;  %p3978_p8 = scmp.lt.s32.totalorder %s77_s16, %s77_s16 }
  0x4d   :  { %p3974_p7 = scmp.ne.s32.totalorder %s77_s16, %s3973_s12  ;;  %p3979_p9 = scmp.lt.s32.totalorder %s3973_s12, %s3973_s12 }
  0x4f   :  { %p3980_p10 = por %p3979_p9, %p3978_p8 }
  0x51   :  { %p3981_p11 = pnand %p3980_p10, %p3974_p7 }
  0x53   :  { %3984 = shalt.err (!%p3981_p11)
}
  0x54   :  { %82 = dma.hbm_to_vmem [thread:$0]  %s4673_s6, 512, %s77_s16, [#allocation10], %s4020_s14, %s4020_s14, %s4021_s19  }
  0x55   :  { %4007 = dma.done.wait [#allocation4], 256  }
  0x56   :  { %4008 = vsyncadd [#allocation4], 4294967040 }
  0x57   :  { %4009 = dma.done.wait [#allocation7], 1024  }
  0x58   :  { %4010 = vsyncadd [#allocation7], 4294966272 }
  0x59   :  { %4011 = dma.done.wait [#allocation10], 1024  }
  0x5a   :  { %4012 = vsyncadd [#allocation10], 4294966272  ;;  %v4024_v0 = vmov 0.0|0.0   ;;  %v4025_v1 = vmov 0.0   ;;  %vm4026_vm0 = vmmov 0   ;;  %v119_v2 = vld [vmem:[#allocation6 + $0x8] sm:$0xff]  ;;  %v124_v22 = vlaneseq }
  0x5b   :  { %3502 = vmatprep.subr.bf16.mxu1 %v4024_v0  ;;  %205 = vmatprep.mubr.f32.mxu0 %v4025_v1  ;;  %v121_v3 = vld [vmem:[#allocation6 + $0x18] sm:$0xff]  ;;  %v104_v4 = vld [vmem:[#allocation8] sm:$0xff]  ;;  %v105_v6 = vld [vmem:[#allocation8 + $0x8] sm:$0xff]  ;;  %vm134_vm1 = vcmask 130048   ;;  %s4028_s19 = smov 32   ;;  %vm218_vm2 = vcmask 261120  }
  0x5c   :  { %3212 = vmatprep.mubr.msk.f32.mxu1 %vm4026_vm0, %v4025_v1  ;;  %v3498_v5 = vpack.c.bf16 %v121_v3, %v119_v2  ;;  %v118_v7 = vld [vmem:[#allocation6] sm:$0xff]  ;;  %v120_v8 = vld [vmem:[#allocation6 + $0x10] sm:$0xff]  ;;  %v4161_v9 = vpack.c.bf16 %v105_v6, %v104_v4  ;;  %v107_v12 = vld [vmem:[#allocation8 + $0x18] sm:$0xff]  ;;  %v125_v23 = vshrl.u32 %v124_v22, 7  ;;  %vm419_vm3 = vcmask 254976  }
  0x5d   :  { %v3500_v10 = vpack.c.bf16 %v120_v8, %v118_v7  ;;  %v106_v11 = vld [vmem:[#allocation8 + $0x10] sm:$0xff]  ;;  %v108_v13 = vld [vmem:[#allocation9] sm:$0xff]  ;;  %v109_v14 = vld [vmem:[#allocation9 + $0x8] sm:$0xff]  ;;  %vm640_vm4 = vcmask 257026   ;;  %vm1085_vm5 = vcmask 261126   ;;  %vm864_vm6 = vcmask 259076  }
  0x5e   :  { %3499 = vmatprep.subr.bf16.mxu0 %v3498_v5  ;;  %3504 = vmatpush3.bf16.msra.mxu1 %v4161_v9  ;;  %v116_v15 = vld [vmem:[#allocation3] sm:$0xff]  ;;  %v4164_v16 = vpack.c.bf16 %v107_v12, %v106_v11  ;;  %v4166_v17 = vpack.c.bf16 %v109_v14, %v108_v13  ;;  %v111_v19 = vld [vmem:[#allocation9 + $0x18] sm:$0xff]  ;;  %v130_v24 = vsub.s32 1, %v125_v23  ;;  %v122_v25 = vld [vmem:[%s4669_s2] sm:$0x3]  ;;  %v126_v27 = vsub.s32 0, %v125_v23 }
  0x5f   :  { %3501 = vmatpush1.bf16.msra.mxu0 %v3500_v10  ;;  %3505 = vmatprep.subr.bf16.mxu1 %v4024_v0  ;;  %v110_v18 = vld [vmem:[#allocation9 + $0x10] sm:$0xff]  ;;  %v117_v20 = vld [vmem:[#allocation3 + $0x8] sm:$0xff]  ;;  %s4027_s2 = smov 64   ;;  %vm646_vm7 = vcmask 521476   ;;  %vm425_vm8 = vcmask 523526   ;;  %vm1091_vm9 = vcmask 517376  }
  0x60   :  { %3508 = vmatprep.subr.bf16.mxu0 %v4024_v0  ;;  %v4173_v21 = vpack.c.bf16 %v111_v19, %v110_v18  ;;  %v131_v26 = vrot.slane %v122_v25, %v130_v24  ;;  %v127_v31 = vrot.slane %v122_v25, %v126_v27  ;;  %vm870_vm10 = vcmask 519426  }
  0x61   :  { %vm1988_vm11 = vcmask 523264   ;;  %vm2998_vm12 = vcmask 74752  }
  0x62   :  { %3017 = vmatmul.mubr.msk.f32.vlgmr.msra.gmra.mrb[0].mxu0 %vm134_vm1, %v116_v15  ;;  %3507 = vmatpush3.bf16.msra.mxu1 %v4164_v16 }
  0x63   :  { %3510 = vmatpush3.bf16.msra.mxu0 %v4166_v17  ;;  %211 = vmatprep.mubr.f32.mxu0 %v4025_v1 }
  0x64   :  { %3511 = vmatprep.subr.bf16.mxu0 %v4024_v0  ;;  %3514 = vmatprep.subr.bf16.mxu1 %v4024_v0 }
  0x65   :  { %3213 = vmatmul.mubr.f32.vlgmr.msra.gmra.mrb[0].mxu1 %v4025_v1 }
  0x66   :  { %3018 = vmatmul.mubr.msk.f32.gmra.mrb[2].mxu0 %vm134_vm1, %v117_v20  ;;  %3516 = vmatpush3.bf16.msra.mxu1 %v4161_v9 }
  0x67   :  { %3513 = vmatpush3.bf16.msra.mxu0 %v4173_v21  ;;  %3223 = vmatprep.mubr.msk.f32.mxu0 %vm4026_vm0, %v4025_v1 }
  0x68   :  { %3520 = vmatprep.subr.bf16.mxu0 %v4024_v0  ;;  %3517 = vmatprep.subr.bf16.mxu1 %v4024_v0 }
  0x69   :  { %3234 = vmatprep.mubr.msk.f32.mxu1 %vm4026_vm0, %v4025_v1 }
  0x6a   :  { %3224 = vmatmul.mubr.f32.vlgmr.msra.gmra.mrb[4].mxu0 %v4025_v1  ;;  %3519 = vmatpush3.bf16.msra.mxu1 %v4164_v16 }
  0x6b   :  { %3522 = vmatpush3.bf16.msra.mxu0 %v4166_v17  ;;  %3245 = vmatprep.mubr.msk.f32.mxu0 %vm4026_vm0, %v4025_v1 }
  0x6c   :  { %3523 = vmatprep.subr.bf16.mxu0 %v4024_v0  ;;  %3526 = vmatprep.subr.bf16.mxu1 %v4024_v0 }
  0x6f   :  { %3525 = vmatpush3.bf16.msra.mxu0 %v4173_v21 }
  0x70   :  { %3532 = vmatprep.subr.bf16.mxu0 %v4024_v0 }
 0x135   :  { %v207_v28 = vpop.f32.mrb[0].mxu0 }
 0x136   :  { %v209_v29 = vpop.f32.mrb[1].mxu0  ;;  %v4204_v38 = vadd.f32 %v207_v28, %v127_v31 }
 0x137   :  { %v4200_v30 = vadd.f32 %v209_v29, %v131_v26 }
 0x138   :  { %v288_v32 = vpop.f32.mrb[0].mxu1 }
 0x139   :  { %v213_v33 = vpop.f32.mrb[2].mxu0  ;;  %v3214_v36 = vpop.f32.mrb[1].mxu1  ;;  %v292_v43 = vadd.f32 %v288_v32, %v4204_v38 }
 0x13a   :  { %v4202_v34 = vadd.f32 %v213_v33, %v127_v31  ;;  %v215_v35 = vpop.f32.mrb[3].mxu0 }
 0x13b   :  { %v4206_v39 = vadd.f32 %v215_v35, %v131_v26  ;;  %v3019_v47 = vmul.f32 -1.442695, %v292_v43 }
 0x13d   :  { %v359_v37 = vpop.f32.mrb[4].mxu0 }
 0x13e   :  { %v364_v40 = vrot.slane %v359_v37, 2  ;;  %v3225_v41 = vpop.f32.mrb[5].mxu0 }
 0x140   :  { %v366_v42 = vadd.f32 %v364_v40, %v4206_v39 }
 0x142   :  { %3683 = vtanh.f32 %v366_v42  ;;  %v3020_v46 = vmul.f32 -1.442695, %v366_v42 }
 0x143   :  { %3685 = vtanh.f32 %v292_v43 }
 0x144   :  { %3687 = vpow2.f32 %v3020_v46 }
 0x145   :  { %3689 = vpow2.f32 %v3019_v47 }
 0x14c   :  { %v3684_v44 = vpop.eup %3683 }
 0x14d   :  { %400 = vrot.lane.b32.xlu0 %v3684_v44, %s4027_s2  ;;  %v3686_v45 = vpop.eup %3685 }
 0x14e   :  { %v3688_v48 = vpop.eup %3687 }
 0x14f   :  { %v394_v49 = vadd.f32 1.0, %v3688_v48  ;;  %v3690_v50 = vpop.eup %3689 }
 0x150   :  { %v370_v51 = vadd.f32 1.0, %v3690_v50 }
 0x151   :  { %376 = vrot.lane.b32.xlu0 %v3686_v45, %s4027_s2  ;;  %3691 = vrcp.f32 %v394_v49 }
 0x152   :  { %3693 = vrcp.f32 %v370_v51 }
 0x15b   :  { %v3692_v52 = vpop.eup %3691 }
 0x15c   :  { %v3694_v55 = vpop.eup %3693  ;;  %v398_v58 = vmul.f32 0.0, %v3692_v52 }
 0x15d   :  { %v374_v61 = vmul.f32 0.0, %v3694_v55 }
 0x1bf   :  { %v401_v53 = vpop.permute.xlu0 %400 }
 0x1c0   :  { %v403_v54 = vmul.f32 %v3692_v52, %v401_v53 }
 0x1c2   :  { %405 = vrot.lane.b32.xlu1 %v403_v54, %s4028_s19 }
 0x1c3   :  { %v377_v56 = vpop.permute.xlu0 %376 }
 0x1c4   :  { %v379_v57 = vmul.f32 %v3694_v55, %v377_v56 }
 0x1c6   :  { %381 = vrot.lane.b32.xlu1 %v379_v57, %s4028_s19 }
 0x234   :  { %v406_v59 = vpop.permute.xlu1 %405 }
 0x235   :  { %v4214_v60 = vadd.f32 %v406_v59, %v398_v58 }
 0x237   :  { %3695 = vtanh.f32 %v4214_v60  ;;  %v617_v41 = vrot.slane %v4214_v60, 2 }
 0x238   :  { %v382_v62 = vpop.permute.xlu1 %381 }
 0x239   :  { %v4217_v63 = vadd.f32 %v382_v62, %v374_v61 }
 0x23b   :  { %3697 = vtanh.f32 %v4217_v63  ;;  %v590_v43 = vrot.slane %v4217_v63, 6 }
 0x241   :  { %v3696_v2 = vpop.eup %3695 }
 0x242   :  { %411 = vrot.lane.b32.xlu0 %v3696_v2, %s4027_s2 }
 0x245   :  { %v3698_v3 = vpop.eup %3697 }
 0x246   :  { %387 = vrot.lane.b32.xlu1 %v3698_v3, %s4027_s2 }
 0x2b4   :  { %v412_v4 = vpop.permute.xlu0 %411 }
 0x2b5   :  { %v4222_v5 = vmul.f32 %v3692_v52, %v412_v4 }
 0x2b7   :  { %v503_v6 = vrot.slane %v4222_v5, 6 }
 0x2b8   :  { %v388_v7 = vpop.permute.xlu1 %387 }
 0x2b9   :  { %v390_v8 = vmul.f32 %v3694_v55, %v388_v7  ;;  %504 = vrot.lane.b32.xlu1 %v503_v6, %s4028_s19 }
 0x2bb   :  { %416 = vrot.lane.b32.xlu0 %v390_v8, %s4028_s19 }
 0x32b   :  { %v505_v10 = vpop.permute.xlu1 %504 }
 0x32c   :  { %3246 = vmatmul.mubr.msk.f32.vlgmr.msra.gmra.mrb[6].mxu0 %vm218_vm2, %v505_v10 }
 0x32d   :  { %v417_v11 = vpop.permute.xlu0 %416  ;;  %3534 = vmatpush3.bf16.msra.mxu0 %v4166_v17  ;;  %3267 = vmatprep.mubr.msk.f32.mxu0 %vm4026_vm0, %v4025_v1 }
 0x32e   :  { %420 = vst.msk [vmem:[#allocation2] sm:$0x3] %vm419_vm3, %v417_v11  ;;  %3235 = vmatmul.mubr.msk.f32.vlgmr.msra.gmra.mrb[2].mxu1 %vm218_vm2, %v417_v11  ;;  %3535 = vmatprep.subr.bf16.mxu0 %v4024_v0 }
 0x32f   :  { %3528 = vmatpush3.bf16.msra.mxu1 %v4161_v9  ;;  %3256 = vmatprep.mubr.msk.f32.mxu1 %vm4026_vm0, %v4025_v1 }
 0x330   :  { %3529 = vmatprep.subr.bf16.mxu1 %v4024_v0 }
 0x331   :  { %3537 = vmatpush3.bf16.msra.mxu0 %v4173_v21 }
 0x332   :  { %3544 = vmatprep.subr.bf16.mxu0 %v4024_v0 }
 0x333   :  { %3531 = vmatpush3.bf16.msra.mxu1 %v4164_v16 }
 0x334   :  { %3538 = vmatprep.subr.bf16.mxu1 %v4024_v0 }
 0x3ff   :  { %v574_v12 = vpop.f32.mrb[6].mxu0 }
 0x400   :  { %v579_v13 = vrot.slane %v574_v12, 4  ;;  %v3247_v14 = vpop.f32.mrb[7].mxu0 }
 0x401   :  { %v495_v15 = vpop.f32.mrb[2].mxu1 }
 0x402   :  { %v581_v18 = vadd.f32 %v579_v13, %v4206_v39  ;;  %v500_v19 = vrot.slane %v495_v15, 6  ;;  %v3236_v20 = vpop.f32.mrb[3].mxu1 }
 0x404   :  { %3699 = vtanh.f32 %v581_v18  ;;  %v502_v22 = vadd.f32 %v500_v19, %v4204_v38  ;;  %v3024_v25 = vmul.f32 -1.442695, %v581_v18 }
 0x406   :  { %3701 = vtanh.f32 %v502_v22  ;;  %v3023_v26 = vmul.f32 -1.442695, %v502_v22 }
 0x407   :  { %3703 = vpow2.f32 %v3024_v25 }
 0x408   :  { %3705 = vpow2.f32 %v3023_v26 }
 0x40e   :  { %v3700_v23 = vpop.eup %3699 }
 0x40f   :  { %621 = vrot.lane.b32.xlu1 %v3700_v23, %s4027_s2 }
 0x410   :  { %v3702_v24 = vpop.eup %3701 }
 0x411   :  { %594 = vrot.lane.b32.xlu0 %v3702_v24, %s4027_s2  ;;  %v3704_v27 = vpop.eup %3703 }
 0x412   :  { %v3706_v28 = vpop.eup %3705  ;;  %v612_v29 = vadd.f32 1.0, %v3704_v27 }
 0x413   :  { %v585_v31 = vadd.f32 1.0, %v3706_v28 }
 0x414   :  { %3707 = vrcp.f32 %v612_v29 }
 0x415   :  { %3709 = vrcp.f32 %v585_v31 }
 0x41e   :  { %v3708_v32 = vpop.eup %3707 }
 0x41f   :  { %v3710_v36 = vpop.eup %3709  ;;  %v619_v42 = vmul.f32 %v3708_v32, %v617_v41 }
 0x420   :  { %v592_v46 = vmul.f32 %v3710_v36, %v590_v43 }
 0x481   :  { %v622_v33 = vpop.permute.xlu1 %621 }
 0x482   :  { %v624_v35 = vmul.f32 %v3708_v32, %v622_v33 }
 0x483   :  { %v595_v37 = vpop.permute.xlu0 %594 }
 0x484   :  { %626 = vrot.lane.b32.xlu1 %v624_v35, %s4028_s19  ;;  %v597_v40 = vmul.f32 %v3710_v36, %v595_v37 }
 0x486   :  { %599 = vrot.lane.b32.xlu0 %v597_v40, %s4028_s19 }
 0x4f6   :  { %v627_v44 = vpop.permute.xlu1 %626 }
 0x4f7   :  { %v4250_v45 = vadd.f32 %v627_v44, %v619_v42 }
 0x4f8   :  { %v600_v47 = vpop.permute.xlu0 %599 }
 0x4f9   :  { %3711 = vtanh.f32 %v4250_v45  ;;  %v4253_v48 = vadd.f32 %v600_v47, %v592_v46  ;;  %v841_v24 = vrot.slane %v4250_v45, 2 }
 0x4fb   :  { %3713 = vtanh.f32 %v4253_v48  ;;  %v814_v26 = vrot.slane %v4253_v48, 6 }
 0x503   :  { %v3712_v49 = vpop.eup %3711 }
 0x504   :  { %632 = vrot.lane.b32.xlu1 %v3712_v49, %s4027_s2 }
 0x505   :  { %v3714_v50 = vpop.eup %3713 }
 0x506   :  { %605 = vrot.lane.b32.xlu0 %v3714_v50, %s4027_s2 }
 0x576   :  { %v633_v51 = vpop.permute.xlu1 %632 }
 0x577   :  { %v4258_v52 = vmul.f32 %v3708_v32, %v633_v51 }
 0x578   :  { %v606_v54 = vpop.permute.xlu0 %605 }
 0x579   :  { %v727_v53 = vrot.slane %v4258_v52, 4  ;;  %v4261_v55 = vmul.f32 %v3710_v36, %v606_v54 }
 0x57b   :  { %728 = vrot.lane.b32.xlu1 %v727_v53, %s4028_s19  ;;  %v648_v56 = vrot.slane %v4261_v55, 2 }
 0x57d   :  { %649 = vrot.lane.b32.xlu0 %v648_v56, %s4028_s19 }
 0x5ed   :  { %v729_v57 = vpop.permute.xlu1 %728 }
 0x5ee   :  { %3268 = vmatmul.mubr.msk.f32.vlgmr.msra.gmra.mrb[8].mxu0 %vm218_vm2, %v729_v57 }
 0x5ef   :  { %3546 = vmatpush3.bf16.msra.mxu0 %v4166_v17  ;;  %3289 = vmatprep.mubr.msk.f32.mxu0 %vm4026_vm0, %v4025_v1  ;;  %v650_v58 = vpop.permute.xlu0 %649 }
 0x5f0   :  { %3547 = vmatprep.subr.bf16.mxu0 %v4024_v0  ;;  %3257 = vmatmul.mubr.msk.f32.vlgmr.msra.gmra.mrb[4].mxu1 %vm218_vm2, %v650_v58 }
 0x5f1   :  { %3540 = vmatpush3.bf16.msra.mxu1 %v4161_v9  ;;  %3278 = vmatprep.mubr.msk.f32.mxu1 %vm4026_vm0, %v4025_v1 }
 0x5f2   :  { %3541 = vmatprep.subr.bf16.mxu1 %v4024_v0 }
 0x5f3   :  { %3549 = vmatpush3.bf16.msra.mxu0 %v4173_v21 }
 0x5f4   :  { %3556 = vmatprep.subr.bf16.mxu0 %v4024_v0 }
 0x5f5   :  { %3543 = vmatpush3.bf16.msra.mxu1 %v4164_v16 }
 0x5f6   :  { %3550 = vmatprep.subr.bf16.mxu1 %v4024_v0 }
 0x6c1   :  { %v798_v59 = vpop.f32.mrb[8].mxu0 }
 0x6c2   :  { %v803_v60 = vrot.slane %v798_v59, 6  ;;  %v3269_v61 = vpop.f32.mrb[9].mxu0 }
 0x6c3   :  { %v719_v63 = vpop.f32.mrb[4].mxu1 }
 0x6c4   :  { %v805_v62 = vadd.f32 %v803_v60, %v4206_v39  ;;  %v724_v2 = vrot.slane %v719_v63, 4  ;;  %v3258_v3 = vpop.f32.mrb[5].mxu1 }
 0x6c6   :  { %3715 = vtanh.f32 %v805_v62  ;;  %v726_v4 = vadd.f32 %v724_v2, %v4204_v38  ;;  %v3028_v8 = vmul.f32 -1.442695, %v805_v62 }
 0x6c8   :  { %3717 = vtanh.f32 %v726_v4  ;;  %v3027_v10 = vmul.f32 -1.442695, %v726_v4 }
 0x6c9   :  { %3719 = vpow2.f32 %v3028_v8 }
 0x6ca   :  { %3721 = vpow2.f32 %v3027_v10 }
 0x6d0   :  { %v3716_v6 = vpop.eup %3715 }
 0x6d1   :  { %845 = vrot.lane.b32.xlu1 %v3716_v6, %s4027_s2 }
 0x6d2   :  { %v3718_v7 = vpop.eup %3717 }
 0x6d3   :  { %818 = vrot.lane.b32.xlu0 %v3718_v7, %s4027_s2  ;;  %v3720_v11 = vpop.eup %3719 }
 0x6d4   :  { %v3722_v12 = vpop.eup %3721  ;;  %v836_v13 = vadd.f32 1.0, %v3720_v11 }
 0x6d5   :  { %v809_v14 = vadd.f32 1.0, %v3722_v12 }
 0x6d6   :  { %3723 = vrcp.f32 %v836_v13 }
 0x6d7   :  { %3725 = vrcp.f32 %v809_v14 }
 0x6e0   :  { %v3724_v15 = vpop.eup %3723 }
 0x6e1   :  { %v3726_v20 = vpop.eup %3725  ;;  %v843_v25 = vmul.f32 %v3724_v15, %v841_v24 }
 0x6e2   :  { %v816_v29 = vmul.f32 %v3726_v20, %v814_v26 }
 0x743   :  { %v846_v18 = vpop.permute.xlu1 %845 }
 0x744   :  { %v848_v19 = vmul.f32 %v3724_v15, %v846_v18 }
 0x745   :  { %v819_v22 = vpop.permute.xlu0 %818 }
 0x746   :  { %850 = vrot.lane.b32.xlu1 %v848_v19, %s4028_s19  ;;  %v821_v23 = vmul.f32 %v3726_v20, %v819_v22 }
 0x748   :  { %823 = vrot.lane.b32.xlu0 %v821_v23, %s4028_s19 }
 0x7b8   :  { %v851_v27 = vpop.permute.xlu1 %850 }
 0x7b9   :  { %v4288_v28 = vadd.f32 %v851_v27, %v843_v25 }
 0x7ba   :  { %v824_v31 = vpop.permute.xlu0 %823 }
 0x7bb   :  { %3727 = vtanh.f32 %v4288_v28  ;;  %v4291_v32 = vadd.f32 %v824_v31, %v816_v29  ;;  %v1062_v6 = vrot.slane %v4288_v28, 2 }
 0x7bd   :  { %3729 = vtanh.f32 %v4291_v32  ;;  %v1035_v11 = vrot.slane %v4291_v32, 6 }
 0x7c5   :  { %v3728_v33 = vpop.eup %3727 }
 0x7c6   :  { %856 = vrot.lane.b32.xlu1 %v3728_v33, %s4027_s2 }
 0x7c7   :  { %v3730_v35 = vpop.eup %3729 }
 0x7c8   :  { %829 = vrot.lane.b32.xlu0 %v3730_v35, %s4027_s2 }
 0x838   :  { %v857_v36 = vpop.permute.xlu1 %856 }
 0x839   :  { %v4296_v37 = vmul.f32 %v3724_v15, %v857_v36 }
 0x83a   :  { %v830_v41 = vpop.permute.xlu0 %829 }
 0x83b   :  { %v951_v40 = vrot.slane %v4296_v37, 2  ;;  %v4299_v42 = vmul.f32 %v3726_v20, %v830_v41 }
 0x83d   :  { %952 = vrot.lane.b32.xlu1 %v951_v40, %s4028_s19  ;;  %v872_v43 = vrot.slane %v4299_v42, 4 }
 0x83f   :  { %873 = vrot.lane.b32.xlu0 %v872_v43, %s4028_s19 }
 0x8af   :  { %v953_v44 = vpop.permute.xlu1 %952 }
 0x8b0   :  { %3290 = vmatmul.mubr.msk.f32.vlgmr.msra.gmra.mrb[10].mxu0 %vm218_vm2, %v953_v44 }
 0x8b1   :  { %3558 = vmatpush3.bf16.msra.mxu0 %v4166_v17  ;;  %3311 = vmatprep.mubr.msk.f32.mxu0 %vm4026_vm0, %v4025_v1  ;;  %v874_v45 = vpop.permute.xlu0 %873 }
 0x8b2   :  { %3559 = vmatprep.subr.bf16.mxu0 %v4024_v0  ;;  %3279 = vmatmul.mubr.msk.f32.vlgmr.msra.gmra.mrb[6].mxu1 %vm218_vm2, %v874_v45 }
 0x8b3   :  { %3552 = vmatpush3.bf16.msra.mxu1 %v4161_v9  ;;  %3300 = vmatprep.mubr.msk.f32.mxu1 %vm4026_vm0, %v4025_v1 }
 0x8b4   :  { %3553 = vmatprep.subr.bf16.mxu1 %v4024_v0 }
 0x8b5   :  { %3561 = vmatpush3.bf16.msra.mxu0 %v4173_v21 }
 0x8b6   :  { %3568 = vmatprep.subr.bf16.mxu0 %v4024_v0 }
 0x8b7   :  { %3555 = vmatpush3.bf16.msra.mxu1 %v4164_v16 }
 0x8b8   :  { %3562 = vmatprep.subr.bf16.mxu1 %v4024_v0 }
 0x983   :  { %v1022_v46 = vpop.f32.mrb[10].mxu0 }
 0x984   :  { %v1026_v47 = vadd.f32 %v1022_v46, %v4206_v39  ;;  %v3291_v48 = vpop.f32.mrb[11].mxu0 }
 0x985   :  { %v943_v49 = vpop.f32.mrb[6].mxu1 }
 0x986   :  { %3731 = vtanh.f32 %v1026_v47  ;;  %v948_v50 = vrot.slane %v943_v49, 2  ;;  %v3280_v51 = vpop.f32.mrb[7].mxu1  ;;  %v3032_v57 = vmul.f32 -1.442695, %v1026_v47 }
 0x988   :  { %v950_v53 = vadd.f32 %v948_v50, %v4204_v38 }
 0x98a   :  { %3733 = vtanh.f32 %v950_v53  ;;  %v3031_v58 = vmul.f32 -1.442695, %v950_v53 }
 0x98b   :  { %3735 = vpow2.f32 %v3032_v57 }
 0x98c   :  { %3737 = vpow2.f32 %v3031_v58 }
 0x990   :  { %v3732_v54 = vpop.eup %3731 }
 0x991   :  { %1066 = vrot.lane.b32.xlu0 %v3732_v54, %s4027_s2 }
 0x994   :  { %v3734_v56 = vpop.eup %3733 }
 0x995   :  { %1039 = vrot.lane.b32.xlu1 %v3734_v56, %s4027_s2  ;;  %v3736_v59 = vpop.eup %3735 }
 0x996   :  { %v1057_v39 = vadd.f32 1.0, %v3736_v59  ;;  %v3738_v60 = vpop.eup %3737 }
 0x997   :  { %v1030_v61 = vadd.f32 1.0, %v3738_v60 }
 0x998   :  { %3739 = vrcp.f32 %v1057_v39 }
 0x999   :  { %3741 = vrcp.f32 %v1030_v61 }
 0x9a2   :  { %v3740_v62 = vpop.eup %3739 }
 0x9a3   :  { %v3742_v2 = vpop.eup %3741  ;;  %v1064_v7 = vmul.f32 %v3740_v62, %v1062_v6 }
 0x9a4   :  { %v1037_v12 = vmul.f32 %v3742_v2, %v1035_v11 }
 0xa03   :  { %v1067_v63 = vpop.permute.xlu0 %1066 }
 0xa04   :  { %v1069_v38 = vmul.f32 %v3740_v62, %v1067_v63 }
 0xa06   :  { %1071 = vrot.lane.b32.xlu0 %v1069_v38, %s4028_s19 }
 0xa07   :  { %v1040_v3 = vpop.permute.xlu1 %1039 }
 0xa08   :  { %v1042_v4 = vmul.f32 %v3742_v2, %v1040_v3 }
 0xa0a   :  { %1044 = vrot.lane.b32.xlu1 %v1042_v4, %s4028_s19 }
 0xa78   :  { %v1072_v8 = vpop.permute.xlu0 %1071 }
 0xa79   :  { %v4325_v10 = vadd.f32 %v1072_v8, %v1064_v7 }
 0xa7b   :  { %3743 = vtanh.f32 %v4325_v10  ;;  %v1282_v56 = vrot.slane %v4325_v10, 2 }
 0xa7c   :  { %v1045_v13 = vpop.permute.xlu1 %1044 }
 0xa7d   :  { %v4329_v14 = vadd.f32 %v1045_v13, %v1037_v12 }
 0xa7f   :  { %3745 = vtanh.f32 %v4329_v14  ;;  %v1255_v39 = vrot.slane %v4329_v14, 6 }
 0xa85   :  { %v3744_v15 = vpop.eup %3743 }
 0xa86   :  { %1077 = vrot.lane.b32.xlu0 %v3744_v15, %s4027_s2 }
 0xa89   :  { %v3746_v18 = vpop.eup %3745 }
 0xa8a   :  { %1050 = vrot.lane.b32.xlu1 %v3746_v18, %s4027_s2 }
 0xaf8   :  { %v1078_v19 = vpop.permute.xlu0 %1077 }
 0xaf9   :  { %v4334_v20 = vmul.f32 %v3740_v62, %v1078_v19 }
 0xafb   :  { %1169 = vrot.lane.b32.xlu0 %v4334_v20, %s4028_s19 }
 0xafc   :  { %v1051_v22 = vpop.permute.xlu1 %1050 }
 0xafd   :  { %v4338_v23 = vmul.f32 %v3742_v2, %v1051_v22 }
 0xaff   :  { %v1093_v24 = vrot.slane %v4338_v23, 6 }
 0xb01   :  { %1094 = vrot.lane.b32.xlu1 %v1093_v24, %s4028_s19 }
 0xb6d   :  { %v1170_v25 = vpop.permute.xlu0 %1169 }
 0xb6e   :  { %3312 = vmatmul.mubr.msk.f32.vlgmr.msra.gmra.mrb[12].mxu0 %vm218_vm2, %v1170_v25 }
 0xb6f   :  { %3570 = vmatpush3.bf16.msra.mxu0 %v4166_v17  ;;  %3333 = vmatprep.mubr.msk.f32.mxu0 %vm4026_vm0, %v4025_v1 }
 0xb70   :  { %3571 = vmatprep.subr.bf16.mxu0 %v4024_v0 }
 0xb73   :  { %3573 = vmatpush3.bf16.msra.mxu0 %v4173_v21  ;;  %v1095_v26 = vpop.permute.xlu1 %1094 }
 0xb74   :  { %3580 = vmatprep.subr.bf16.mxu0 %v4024_v0  ;;  %3301 = vmatmul.mubr.msk.f32.vlgmr.msra.gmra.mrb[8].mxu1 %vm218_vm2, %v1095_v26 }
 0xb75   :  { %3564 = vmatpush3.bf16.msra.mxu1 %v4161_v9  ;;  %3322 = vmatprep.mubr.msk.f32.mxu1 %vm4026_vm0, %v4025_v1 }
 0xb76   :  { %3565 = vmatprep.subr.bf16.mxu1 %v4024_v0 }
 0xb79   :  { %3567 = vmatpush3.bf16.msra.mxu1 %v4164_v16 }
 0xb7a   :  { %3574 = vmatprep.subr.bf16.mxu1 %v4024_v0 }
 0xc41   :  { %v1239_v27 = vpop.f32.mrb[12].mxu0 }
 0xc42   :  { %v1244_v28 = vrot.slane %v1239_v27, 2  ;;  %v3313_v29 = vpop.f32.mrb[13].mxu0 }
 0xc44   :  { %v1246_v31 = vadd.f32 %v1244_v28, %v4200_v30 }
 0xc46   :  { %3747 = vtanh.f32 %v1246_v31  ;;  %v3036_v41 = vmul.f32 -1.442695, %v1246_v31 }
 0xc47   :  { %v1164_v32 = vpop.f32.mrb[8].mxu1 }
 0xc48   :  { %v1168_v33 = vadd.f32 %v1164_v32, %v4202_v34  ;;  %v3302_v35 = vpop.f32.mrb[9].mxu1 }
 0xc4a   :  { %3749 = vtanh.f32 %v1168_v33  ;;  %v3035_v43 = vmul.f32 -1.442695, %v1168_v33 }
 0xc4b   :  { %3751 = vpow2.f32 %v3036_v41 }
 0xc4c   :  { %3753 = vpow2.f32 %v3035_v43 }
 0xc50   :  { %v3748_v36 = vpop.eup %3747 }
 0xc51   :  { %1286 = vrot.lane.b32.xlu0 %v3748_v36, %s4027_s2 }
 0xc54   :  { %v3750_v40 = vpop.eup %3749 }
 0xc55   :  { %1259 = vrot.lane.b32.xlu1 %v3750_v40, %s4027_s2  ;;  %v3752_v44 = vpop.eup %3751 }
 0xc56   :  { %v1277_v45 = vadd.f32 1.0, %v3752_v44  ;;  %v3754_v46 = vpop.eup %3753 }
 0xc57   :  { %v1250_v47 = vadd.f32 1.0, %v3754_v46 }
 0xc58   :  { %3755 = vrcp.f32 %v1277_v45 }
 0xc59   :  { %3757 = vrcp.f32 %v1250_v47 }
 0xc62   :  { %v3756_v48 = vpop.eup %3755 }
 0xc63   :  { %v3758_v51 = vpop.eup %3757  ;;  %v1284_v57 = vmul.f32 %v3756_v48, %v1282_v56 }
 0xc64   :  { %v1257_v60 = vmul.f32 %v3758_v51, %v1255_v39 }
 0xcc3   :  { %v1287_v49 = vpop.permute.xlu0 %1286 }
 0xcc4   :  { %v1289_v50 = vmul.f32 %v3756_v48, %v1287_v49 }
 0xcc6   :  { %1291 = vrot.lane.b32.xlu0 %v1289_v50, %s4028_s19 }
 0xcc7   :  { %v1260_v53 = vpop.permute.xlu1 %1259 }
 0xcc8   :  { %v1262_v54 = vmul.f32 %v3758_v51, %v1260_v53 }
 0xcca   :  { %1264 = vrot.lane.b32.xlu1 %v1262_v54, %s4028_s19 }
 0xd38   :  { %v1292_v58 = vpop.permute.xlu0 %1291 }
 0xd39   :  { %v4363_v59 = vadd.f32 %v1292_v58, %v1284_v57 }
 0xd3b   :  { %3759 = vtanh.f32 %v4363_v59  ;;  %v1501_v44 = vrot.slane %v4363_v59, 2 }
 0xd3c   :  { %v1265_v61 = vpop.permute.xlu1 %1264 }
 0xd3d   :  { %v4367_v62 = vadd.f32 %v1265_v61, %v1257_v60 }
 0xd3f   :  { %3761 = vtanh.f32 %v4367_v62  ;;  %v1474_v46 = vrot.slane %v4367_v62, 6 }
 0xd45   :  { %v3760_v63 = vpop.eup %3759 }
 0xd46   :  { %1297 = vrot.lane.b32.xlu0 %v3760_v63, %s4027_s2 }
 0xd49   :  { %v3762_v38 = vpop.eup %3761 }
 0xd4a   :  { %1270 = vrot.lane.b32.xlu1 %v3762_v38, %s4027_s2 }
 0xdb8   :  { %v1298_v2 = vpop.permute.xlu0 %1297 }
 0xdb9   :  { %v4372_v3 = vmul.f32 %v3756_v48, %v1298_v2 }
 0xdbb   :  { %v1387_v4 = vrot.slane %v4372_v3, 6 }
 0xdbc   :  { %v1271_v6 = vpop.permute.xlu1 %1270 }
 0xdbd   :  { %1388 = vrot.lane.b32.xlu1 %v1387_v4, %s4028_s19  ;;  %v1273_v7 = vmul.f32 %v3758_v51, %v1271_v6 }
 0xdbf   :  { %1302 = vrot.lane.b32.xlu0 %v1273_v7, %s4028_s19 }
 0xe2f   :  { %v1389_v8 = vpop.permute.xlu1 %1388 }
 0xe30   :  { %3334 = vmatmul.mubr.msk.f32.vlgmr.msra.gmra.mrb[14].mxu0 %vm218_vm2, %v1389_v8 }
 0xe31   :  { %3582 = vmatpush3.bf16.msra.mxu0 %v4166_v17  ;;  %3355 = vmatprep.mubr.msk.f32.mxu0 %vm4026_vm0, %v4025_v1  ;;  %v4381_v10 = vpop.permute.xlu0 %1302 }
 0xe32   :  { %3583 = vmatprep.subr.bf16.mxu0 %v4024_v0  ;;  %3323 = vmatmul.mubr.msk.f32.vlgmr.msra.gmra.mrb[10].mxu1 %vm218_vm2, %v4381_v10 }
 0xe33   :  { %3576 = vmatpush3.bf16.msra.mxu1 %v4161_v9  ;;  %3344 = vmatprep.mubr.msk.f32.mxu1 %vm4026_vm0, %v4025_v1 }
 0xe34   :  { %3577 = vmatprep.subr.bf16.mxu1 %v4024_v0 }
 0xe35   :  { %3585 = vmatpush3.bf16.msra.mxu0 %v4173_v21 }
 0xe36   :  { %3592 = vmatprep.subr.bf16.mxu0 %v4024_v0 }
 0xe37   :  { %3579 = vmatpush3.bf16.msra.mxu1 %v4164_v16 }
 0xe38   :  { %3586 = vmatprep.subr.bf16.mxu1 %v4024_v0 }
 0xf03   :  { %v1458_v11 = vpop.f32.mrb[14].mxu0 }
 0xf04   :  { %v1463_v12 = vrot.slane %v1458_v11, 4  ;;  %v3335_v13 = vpop.f32.mrb[15].mxu0 }
 0xf05   :  { %v1379_v15 = vpop.f32.mrb[10].mxu1 }
 0xf06   :  { %v1465_v14 = vadd.f32 %v1463_v12, %v4200_v30  ;;  %v1384_v18 = vrot.slane %v1379_v15, 6  ;;  %v3324_v19 = vpop.f32.mrb[11].mxu1 }
 0xf08   :  { %3763 = vtanh.f32 %v1465_v14  ;;  %v1386_v22 = vadd.f32 %v1384_v18, %v4202_v34  ;;  %v3040_v26 = vmul.f32 -1.442695, %v1465_v14 }
 0xf0a   :  { %3765 = vtanh.f32 %v1386_v22  ;;  %v3039_v27 = vmul.f32 -1.442695, %v1386_v22 }
 0xf0b   :  { %3767 = vpow2.f32 %v3040_v26 }
 0xf0c   :  { %3769 = vpow2.f32 %v3039_v27 }
 0xf12   :  { %v3764_v24 = vpop.eup %3763 }
 0xf13   :  { %1505 = vrot.lane.b32.xlu1 %v3764_v24, %s4027_s2 }
 0xf14   :  { %v3766_v25 = vpop.eup %3765 }
 0xf15   :  { %1478 = vrot.lane.b32.xlu0 %v3766_v25, %s4027_s2  ;;  %v3768_v28 = vpop.eup %3767 }
 0xf16   :  { %v3770_v29 = vpop.eup %3769  ;;  %v1496_v31 = vadd.f32 1.0, %v3768_v28 }
 0xf17   :  { %v1469_v32 = vadd.f32 1.0, %v3770_v29 }
 0xf18   :  { %3771 = vrcp.f32 %v1496_v31 }
 0xf19   :  { %3773 = vrcp.f32 %v1469_v32 }
 0xf22   :  { %v3772_v33 = vpop.eup %3771 }
 0xf23   :  { %v3774_v40 = vpop.eup %3773  ;;  %v1503_v45 = vmul.f32 %v3772_v33, %v1501_v44 }
 0xf24   :  { %v1476_v49 = vmul.f32 %v3774_v40, %v1474_v46 }
 0xf85   :  { %v1506_v35 = vpop.permute.xlu1 %1505 }
 0xf86   :  { %v1508_v36 = vmul.f32 %v3772_v33, %v1506_v35 }
 0xf87   :  { %v1479_v41 = vpop.permute.xlu0 %1478 }
 0xf88   :  { %1510 = vrot.lane.b32.xlu1 %v1508_v36, %s4028_s19  ;;  %v1481_v43 = vmul.f32 %v3774_v40, %v1479_v41 }
 0xf8a   :  { %1483 = vrot.lane.b32.xlu0 %v1481_v43, %s4028_s19 }
 0xffa   :  { %v1511_v47 = vpop.permute.xlu1 %1510 }
 0xffb   :  { %v4402_v48 = vadd.f32 %v1511_v47, %v1503_v45 }
 0xffc   :  { %v1484_v50 = vpop.permute.xlu0 %1483 }
 0xffd   :  { %3775 = vtanh.f32 %v4402_v48  ;;  %v4405_v51 = vadd.f32 %v1484_v50, %v1476_v49  ;;  %v1723_v27 = vrot.slane %v4402_v48, 2 }
 0xfff   :  { %3777 = vtanh.f32 %v4405_v51  ;;  %v1696_v29 = vrot.slane %v4405_v51, 6 }
0x1007   :  { %v3776_v53 = vpop.eup %3775 }
0x1008   :  { %1516 = vrot.lane.b32.xlu1 %v3776_v53, %s4027_s2 }
0x1009   :  { %v3778_v54 = vpop.eup %3777 }
0x100a   :  { %1489 = vrot.lane.b32.xlu0 %v3778_v54, %s4027_s2 }
0x107a   :  { %v1517_v56 = vpop.permute.xlu1 %1516 }
0x107b   :  { %v4410_v57 = vmul.f32 %v3772_v33, %v1517_v56 }
0x107c   :  { %v1490_v59 = vpop.permute.xlu0 %1489 }
0x107d   :  { %v1609_v58 = vrot.slane %v4410_v57, 4  ;;  %v4413_v39 = vmul.f32 %v3774_v40, %v1490_v59 }
0x107f   :  { %1610 = vrot.lane.b32.xlu1 %v1609_v58, %s4028_s19  ;;  %v1530_v60 = vrot.slane %v4413_v39, 2 }
0x1081   :  { %1531 = vrot.lane.b32.xlu0 %v1530_v60, %s4028_s19 }
0x10f1   :  { %v1611_v61 = vpop.permute.xlu1 %1610 }
0x10f2   :  { %3356 = vmatmul.mubr.msk.f32.vlgmr.msra.gmra.mrb[16].mxu0 %vm218_vm2, %v1611_v61 }
0x10f3   :  { %3594 = vmatpush3.bf16.msra.mxu0 %v4166_v17  ;;  %3377 = vmatprep.mubr.msk.f32.mxu0 %vm4026_vm0, %v4025_v1  ;;  %v1532_v62 = vpop.permute.xlu0 %1531 }
0x10f4   :  { %3595 = vmatprep.subr.bf16.mxu0 %v4024_v0  ;;  %3345 = vmatmul.mubr.msk.f32.vlgmr.msra.gmra.mrb[12].mxu1 %vm218_vm2, %v1532_v62 }
0x10f5   :  { %3588 = vmatpush3.bf16.msra.mxu1 %v4161_v9  ;;  %3366 = vmatprep.mubr.msk.f32.mxu1 %vm4026_vm0, %v4025_v1 }
0x10f6   :  { %3589 = vmatprep.subr.bf16.mxu1 %v4024_v0 }
0x10f7   :  { %3597 = vmatpush3.bf16.msra.mxu0 %v4173_v21 }
0x10f8   :  { %3614 = vmatprep.subr.bf16.mxu0 %v4024_v0 }
0x10f9   :  { %3591 = vmatpush3.bf16.msra.mxu1 %v4164_v16 }
0x11c5   :  { %v1680_v17 = vpop.f32.mrb[16].mxu0 }
0x11c6   :  { %v1685_v63 = vrot.slane %v1680_v17, 6  ;;  %v3357_v38 = vpop.f32.mrb[17].mxu0 }
0x11c7   :  { %v1601_v4 = vpop.f32.mrb[12].mxu1 }
0x11c8   :  { %v1687_v2 = vadd.f32 %v1685_v63, %v4200_v30  ;;  %v1606_v6 = vrot.slane %v1601_v4, 4  ;;  %v3346_v7 = vpop.f32.mrb[13].mxu1 }
0x11ca   :  { %3779 = vtanh.f32 %v1687_v2  ;;  %v1608_v9 = vadd.f32 %v1606_v6, %v4202_v34  ;;  %v3044_v11 = vmul.f32 -1.442695, %v1687_v2 }
0x11cc   :  { %3781 = vtanh.f32 %v1608_v9  ;;  %v3043_v16 = vmul.f32 -1.442695, %v1608_v9 }
0x11cd   :  { %3783 = vpow2.f32 %v3044_v11 }
0x11ce   :  { %3785 = vpow2.f32 %v3043_v16 }
0x11d4   :  { %v3780_v8 = vpop.eup %3779 }
0x11d5   :  { %1727 = vrot.lane.b32.xlu1 %v3780_v8, %s4027_s2 }
0x11d6   :  { %v3782_v21 = vpop.eup %3781 }
0x11d7   :  { %1700 = vrot.lane.b32.xlu0 %v3782_v21, %s4027_s2  ;;  %v3784_v12 = vpop.eup %3783 }
0x11d8   :  { %v3786_v13 = vpop.eup %3785  ;;  %v1718_v14 = vadd.f32 1.0, %v3784_v12 }
0x11d9   :  { %v1691_v15 = vadd.f32 1.0, %v3786_v13 }
0x11da   :  { %3787 = vrcp.f32 %v1718_v14 }
0x11db   :  { %3789 = vrcp.f32 %v1691_v15 }
0x11e4   :  { %v3788_v18 = vpop.eup %3787 }
0x11e5   :  { %v3790_v24 = vpop.eup %3789  ;;  %v1725_v28 = vmul.f32 %v3788_v18, %v1723_v27  ;;  %v1979_v27 = vld [vmem:[%s4672_s5 + $0x30] sm:$0xff] }
0x11e6   :  { %v1698_v33 = vmul.f32 %v3790_v24, %v1696_v29 }
0x1247   :  { %v1728_v19 = vpop.permute.xlu1 %1727 }
0x1248   :  { %v1730_v22 = vmul.f32 %v3788_v18, %v1728_v19 }
0x1249   :  { %v1701_v25 = vpop.permute.xlu0 %1700 }
0x124a   :  { %1732 = vrot.lane.b32.xlu1 %v1730_v22, %s4028_s19  ;;  %v1703_v26 = vmul.f32 %v3790_v24, %v1701_v25  ;;  %v113_v25 = vld [vmem:[#allocation11 + $0x8] sm:$0xff] }
0x124c   :  { %1705 = vrot.lane.b32.xlu0 %v1703_v26, %s4028_s19 }
0x12bc   :  { %v1733_v31 = vpop.permute.xlu1 %1732 }
0x12bd   :  { %v1735_v32 = vadd.f32 %v1733_v31, %v1725_v28  ;;  %v1980_v28 = vld [vmem:[%s4672_s5 + $0x38] sm:$0xff]  ;;  %v114_v31 = vld [vmem:[#allocation11 + $0x10] sm:$0xff] }
0x12be   :  { %v1706_v35 = vpop.permute.xlu0 %1705  ;;  %v3610_v29 = vpack.c.bf16 %v1980_v28, %v1979_v27 }
0x12bf   :  { %3791 = vtanh.f32 %v1735_v32  ;;  %v1708_v36 = vadd.f32 %v1706_v35, %v1698_v33  ;;  %v1942_v11 = vrot.slane %v1735_v32, 2  ;;  %v115_v32 = vld [vmem:[#allocation11 + $0x18] sm:$0xff] }
0x12c0   :  { %v4519_v33 = vpack.c.bf16 %v115_v32, %v114_v31 }
0x12c1   :  { %3793 = vtanh.f32 %v1708_v36  ;;  %v1915_v14 = vrot.slane %v1708_v36, 6 }
0x12c9   :  { %v3792_v40 = vpop.eup %3791 }
0x12ca   :  { %1738 = vrot.lane.b32.xlu1 %v3792_v40, %s4027_s2 }
0x12cb   :  { %v3794_v41 = vpop.eup %3793 }
0x12cc   :  { %1711 = vrot.lane.b32.xlu0 %v3794_v41, %s4027_s2 }
0x133c   :  { %v1739_v43 = vpop.permute.xlu1 %1738 }
0x133d   :  { %v4441_v44 = vmul.f32 %v3788_v18, %v1739_v43 }
0x133e   :  { %v1712_v46 = vpop.permute.xlu0 %1711 }
0x133f   :  { %v1831_v45 = vrot.slane %v4441_v44, 2  ;;  %v4444_v47 = vmul.f32 %v3790_v24, %v1712_v46 }
0x1341   :  { %1832 = vrot.lane.b32.xlu1 %v1831_v45, %s4028_s19  ;;  %v1752_v48 = vrot.slane %v4444_v47, 4 }
0x1343   :  { %1753 = vrot.lane.b32.xlu0 %v1752_v48, %s4028_s19 }
0x13b3   :  { %v1833_v49 = vpop.permute.xlu1 %1832 }
0x13b4   :  { %3378 = vmatmul.mubr.msk.f32.vlgmr.msra.gmra.mrb[18].mxu0 %vm218_vm2, %v1833_v49 }
0x13b5   :  { %3407 = vmatprep.mubr.msk.f32.mxu0 %vm4026_vm0, %v4025_v1  ;;  %v1754_v50 = vpop.permute.xlu0 %1753 }
0x13b6   :  { %3367 = vmatmul.mubr.msk.f32.vlgmr.msra.gmra.mrb[14].mxu1 %vm218_vm2, %v1754_v50 }
0x1487   :  { %v1902_v51 = vpop.f32.mrb[18].mxu0 }
0x1488   :  { %v1906_v53 = vadd.f32 %v1902_v51, %v4200_v30  ;;  %v3379_v54 = vpop.f32.mrb[19].mxu0 }
0x1489   :  { %v1823_v56 = vpop.f32.mrb[14].mxu1 }
0x148a   :  { %3795 = vtanh.f32 %v1906_v53  ;;  %v1828_v58 = vrot.slane %v1823_v56, 2  ;;  %v3368_v59 = vpop.f32.mrb[15].mxu1  ;;  %v3048_v17 = vmul.f32 -1.442695, %v1906_v53 }
0x148c   :  { %v1830_v60 = vadd.f32 %v1828_v58, %v4202_v34 }
0x148e   :  { %3797 = vtanh.f32 %v1830_v60  ;;  %v3047_v63 = vmul.f32 -1.442695, %v1830_v60 }
0x148f   :  { %3799 = vpow2.f32 %v3048_v17  ;;  %v3049_v17 = vld [vmem:[%s4674_s7] ss:$0 sm:$0xff] }
0x1490   :  { %3801 = vpow2.f32 %v3047_v63 }
0x1494   :  { %v3796_v61 = vpop.eup %3795 }
0x1495   :  { %1946 = vrot.lane.b32.xlu0 %v3796_v61, %s4027_s2 }
0x1498   :  { %v3798_v62 = vpop.eup %3797 }
0x1499   :  { %1919 = vrot.lane.b32.xlu1 %v3798_v62, %s4027_s2  ;;  %v3800_v38 = vpop.eup %3799 }
0x149a   :  { %v1937_v30 = vadd.f32 1.0, %v3800_v38  ;;  %v3802_v2 = vpop.eup %3801 }
0x149b   :  { %v1910_v4 = vadd.f32 1.0, %v3802_v2 }
0x149c   :  { %3803 = vrcp.f32 %v1937_v30 }
0x149d   :  { %3805 = vrcp.f32 %v1910_v4 }
0x14a6   :  { %v4457_v6 = vpop.eup %3803 }
0x14a7   :  { %v4461_v9 = vpop.eup %3805  ;;  %v1944_v16 = vmul.f32 %v4457_v6, %v1942_v11 }
0x14a8   :  { %v1917_v15 = vmul.f32 %v4461_v9, %v1915_v14 }
0x1507   :  { %v1947_v34 = vpop.permute.xlu0 %1946 }
0x1508   :  { %v1949_v7 = vmul.f32 %v4457_v6, %v1947_v34 }
0x150a   :  { %1951 = vrot.lane.b32.xlu0 %v1949_v7, %s4028_s19 }
0x150b   :  { %v1920_v8 = vpop.permute.xlu1 %1919 }
0x150c   :  { %v1922_v21 = vmul.f32 %v4461_v9, %v1920_v8 }
0x150e   :  { %1924 = vrot.lane.b32.xlu1 %v1922_v21, %s4028_s19 }
0x157c   :  { %v1952_v12 = vpop.permute.xlu0 %1951 }
0x157d   :  { %v1954_v13 = vadd.f32 %v1952_v12, %v1944_v16 }
0x157f   :  { %3807 = vtanh.f32 %v1954_v13 }
0x1580   :  { %v1925_v18 = vpop.permute.xlu1 %1924 }
0x1581   :  { %v1927_v19 = vadd.f32 %v1925_v18, %v1917_v15 }
0x1583   :  { %3809 = vtanh.f32 %v1927_v19 }
0x1589   :  { %v3808_v22 = vpop.eup %3807 }
0x158a   :  { %1957 = vrot.lane.b32.xlu0 %v3808_v22, %s4027_s2 }
0x158d   :  { %v3810_v24 = vpop.eup %3809 }
0x158e   :  { %637 = vrot.lane.b32.xlu0 %v4261_v55, %s4028_s19  ;;  %1930 = vrot.lane.b32.xlu1 %v3810_v24, %s4027_s2  ;;  %v1973_v55 = vld [vmem:[%s4672_s5] sm:$0xff] }
0x1592   :  { %1082 = vrot.lane.b32.xlu0 %v4338_v23, %s4028_s19  ;;  %861 = vrot.lane.b32.xlu1 %v4299_v42, %s4028_s19  ;;  %v1974_v23 = vld [vmem:[%s4672_s5 + $0x8] sm:$0xff] }
0x1593   :  { %v3598_v42 = vpack.c.bf16 %v1974_v23, %v1973_v55 }
0x1595   :  { %3599 = vmatprep.subr.bf16.mxu1 %v3598_v42 }
0x1596   :  { %643 = vrot.lane.b32.xlu0 %v4258_v52, %s4027_s2  ;;  %422 = vrot.lane.b32.xlu1 %v4222_v5, %s4027_s2  ;;  %v1975_v5 = vld [vmem:[%s4672_s5 + $0x10] sm:$0xff]  ;;  %v1976_v52 = vld [vmem:[%s4672_s5 + $0x18] sm:$0xff] }
0x1597   :  { %3601 = vmatpush3.bf16.msra.mxu1 %v3598_v42 }
0x159a   :  { %1088 = vrot.lane.b32.xlu0 %v4334_v20, %s4027_s2  ;;  %867 = vrot.lane.b32.xlu1 %v4296_v37, %s4027_s2  ;;  %v3602_v37 = vpack.c.bf16 %v1976_v52, %v1975_v5  ;;  %v1977_v20 = vld [vmem:[%s4672_s5 + $0x20] sm:$0xff] }
0x159c   :  { %3603 = vmatprep.subr.bf16.mxu1 %v3602_v37 }
0x159d   :  { %3605 = vmatpush3.bf16.msra.mxu1 %v3602_v37 }
0x159e   :  { %1526 = vrot.lane.b32.xlu0 %v4410_v57, %s4027_s2  ;;  %1307 = vrot.lane.b32.xlu1 %v4372_v3, %s4027_s2  ;;  %v1978_v3 = vld [vmem:[%s4672_s5 + $0x28] sm:$0xff]  ;;  %v112_v57 = vld [vmem:[#allocation11] sm:$0xff] }
0x159f   :  { %v4509_v26 = vpack.c.bf16 %v113_v25, %v112_v57 }
0x15a1   :  { %3616 = vmatpush3.bf16.msra.mxu0 %v4509_v26 }
0x15a2   :  { %1748 = vrot.lane.b32.xlu1 %v4441_v44, %s4027_s2  ;;  %3617 = vmatprep.subr.bf16.mxu0 %v4024_v0 }
0x15a5   :  { %3619 = vmatpush3.bf16.msra.mxu0 %v4519_v33 }
0x15a6   :  { %1521 = vrot.lane.b32.xlu1 %v4413_v39, %s4028_s19  ;;  %v3606_v39 = vpack.c.bf16 %v1978_v3, %v1977_v20  ;;  %3620 = vmatprep.subr.bf16.mxu0 %v4024_v0 }
0x15a8   :  { %3607 = vmatprep.subr.bf16.mxu1 %v3606_v39  ;;  %3408 = vmatmul.mubr.f32.vlgmr.msra.gmra.mrb[20].mxu0 %v4025_v1 }
0x15a9   :  { %3609 = vmatpush3.bf16.msra.mxu1 %v3606_v39  ;;  %3622 = vmatpush3.bf16.msra.mxu0 %v4509_v26 }
0x15aa   :  { %3611 = vmatprep.subr.bf16.mxu1 %v3610_v29  ;;  %3418 = vmatprep.mubr.msk.f32.mxu0 %vm4026_vm0, %v4025_v1 }
0x15ab   :  { %3623 = vmatprep.subr.bf16.mxu0 %v4024_v0 }
0x15ad   :  { %3613 = vmatpush3.bf16.msra.mxu1 %v3610_v29  ;;  %3625 = vmatpush3.bf16.msra.mxu0 %v4519_v33 }
0x15ae   :  { %3626 = vmatprep.subr.bf16.mxu1 %v4024_v0  ;;  %3632 = vmatprep.subr.bf16.mxu0 %v4024_v0 }
0x15fc   :  { %v1958_v35 = vpop.permute.xlu0 %1957 }
0x15fd   :  { %v1960_v36 = vmul.f32 %v4457_v6, %v1958_v35 }
0x15ff   :  { %1967 = vrot.lane.b32.xlu0 %v1960_v36, %s4027_s2 }
0x1600   :  { %v638_v40 = vpop.permute.xlu0 %637  ;;  %v1931_v41 = vpop.permute.xlu1 %1930 }
0x1601   :  { %641 = vst.msk [vmem:[#allocation2] sm:$0xc] %vm640_vm4, %v638_v40  ;;  %v1933_v43 = vmul.f32 %v4461_v9, %v1931_v41 }
0x1603   :  { %1743 = vrot.lane.b32.xlu0 %v4444_v47, %s4028_s19  ;;  %1962 = vrot.lane.b32.xlu1 %v1933_v43, %s4028_s19 }
0x1604   :  { %v1083_v44 = vpop.permute.xlu0 %1082  ;;  %v862_v45 = vpop.permute.xlu1 %861 }
0x1605   :  { %1086 = vst.msk [vmem:[#allocation2] sm:$0xc0] %vm1085_vm5, %v1083_v44 }
0x1606   :  { %865 = vst.msk [vmem:[#allocation2] sm:$0x30] %vm864_vm6, %v862_v45 }
0x1608   :  { %v644_v46 = vpop.permute.xlu0 %643  ;;  %v423_v48 = vpop.permute.xlu1 %422 }
0x1609   :  { %647 = vst.msk [vmem:[#allocation2 + $0x8] sm:$0x30] %vm646_vm7, %v644_v46 }
0x160a   :  { %426 = vst.msk [vmem:[#allocation2 + $0x8] sm:$0xc0] %vm425_vm8, %v423_v48 }
0x160c   :  { %v1089_v47 = vpop.permute.xlu0 %1088  ;;  %v868_v49 = vpop.permute.xlu1 %867 }
0x160d   :  { %1092 = vst.msk [vmem:[#allocation2 + $0x8] sm:$0x3] %vm1091_vm9, %v1089_v47 }
0x160e   :  { %1305 = vst.msk [vmem:[#allocation2 + $0x8] sm:$0x3] %vm419_vm3, %v4381_v10 }
0x160f   :  { %871 = vst.msk [vmem:[#allocation2 + $0x8] sm:$0xc] %vm870_vm10, %v868_v49 }
0x1610   :  { %v1527_v50 = vpop.permute.xlu0 %1526  ;;  %v1308_v51 = vpop.permute.xlu1 %1307 }
0x1611   :  { %1529 = vst.msk [vmem:[#allocation2] sm:$0x30] %vm646_vm7, %v1527_v50 }
0x1612   :  { %1310 = vst.msk [vmem:[#allocation2] sm:$0xc0] %vm425_vm8, %v1308_v51 }
0x1614   :  { %v1749_v53 = vpop.permute.xlu1 %1748 }
0x1615   :  { %1751 = vst.msk [vmem:[#allocation2] sm:$0xc] %vm870_vm10, %v1749_v53 }
0x1618   :  { %v1522_v54 = vpop.permute.xlu1 %1521 }
0x1619   :  { %1524 = vst.msk [vmem:[#allocation2 + $0x8] sm:$0xc] %vm640_vm4, %v1522_v54 }
0x1671   :  { %v1968_v56 = vpop.permute.xlu0 %1967 }
0x1672   :  { %1970 = vst.msk [vmem:[#allocation2] sm:$0x3] %vm1091_vm9, %v1968_v56 }
0x1675   :  { %v1744_v58 = vpop.permute.xlu0 %1743  ;;  %v1963_v59 = vpop.permute.xlu1 %1962 }
0x1676   :  { %1746 = vst.msk [vmem:[#allocation2 + $0x8] sm:$0x30] %vm864_vm6, %v1744_v58 }
0x1677   :  { %1965 = vst.msk [vmem:[#allocation2 + $0x8] sm:$0xc0] %vm1085_vm5, %v1963_v59 }
0x1679   :  { %v1971_v10 = vld [vmem:[#allocation2] sm:$0xff] }
0x167a   :  { %3396 = vmatprep.mubr.msk.f32.mxu1 %vm1988_vm11, %v1971_v10 }
0x167b   :  { %v2136_v61 = vpop.f32.mrb[20].mxu0 }
0x167c   :  { %v3409_v62 = vpop.f32.mrb[21].mxu0  ;;  %v2141_v63 = vrot.slane %v2136_v61, 2 }
0x167e   :  { %v1972_v60 = vld [vmem:[#allocation2 + $0x8] sm:$0xff] }
0x167f   :  { %3397 = vmatmul.mubr.msk.f32.vlgmr.msra.gmra.mrb[16].mxu1 %vm1988_vm11, %v1972_v60 }
0x1680   :  { %3628 = vmatpush3.bf16.msra.mxu1 %v4509_v26  ;;  %3429 = vmatprep.mubr.msk.f32.mxu1 %vm4026_vm0, %v4025_v1 }
0x1681   :  { %3629 = vmatprep.subr.bf16.mxu1 %v4024_v0 }
0x1684   :  { %3631 = vmatpush3.bf16.msra.mxu1 %v4519_v33 }
0x1685   :  { %3638 = vmatprep.subr.bf16.mxu1 %v4024_v0 }
0x1752   :  { %v3398_v38 = vpop.f32.mrb[16].mxu1 }
0x1753   :  { %v4556_v30 = vadd.f32 %v3398_v38, %v3049_v17  ;;  %v2061_v2 = vpop.f32.mrb[17].mxu1 }
0x1754   :  { %v4558_v4 = vadd.f32 %v3049_v17, %v2061_v2 }
0x1755   :  { %v2143_v6 = vadd.f32 %v2141_v63, %v4556_v30 }
0x1757   :  { %3811 = vtanh.f32 %v2143_v6  ;;  %v3052_v7 = vmul.f32 -1.442695, %v2143_v6 }
0x1759   :  { %3813 = vpow2.f32 %v3052_v7 }
0x1761   :  { %v3812_v34 = vpop.eup %3811 }
0x1762   :  { %2153 = vrot.lane.b32.xlu0 %v3812_v34, %s4027_s2 }
0x1763   :  { %v3814_v9 = vpop.eup %3813 }
0x1764   :  { %v2147_v8 = vadd.f32 1.0, %v3814_v9 }
0x1766   :  { %3815 = vrcp.f32 %v2147_v8 }
0x1770   :  { %v3816_v21 = vpop.eup %3815 }
0x1771   :  { %v2151_v12 = vmul.f32 0.0, %v3816_v21 }
0x17d4   :  { %v2154_v11 = vpop.permute.xlu0 %2153 }
0x17d5   :  { %v2156_v16 = vmul.f32 %v3816_v21, %v2154_v11 }
0x17d7   :  { %2158 = vrot.lane.b32.xlu1 %v2156_v16, %s4028_s19 }
0x1849   :  { %v2159_v13 = vpop.permute.xlu1 %2158 }
0x184a   :  { %v2161_v14 = vadd.f32 %v2159_v13, %v2151_v12 }
0x184c   :  { %3817 = vtanh.f32 %v2161_v14  ;;  %v2256_v27 = vrot.slane %v2161_v14, 2 }
0x1856   :  { %v3818_v15 = vpop.eup %3817 }
0x1857   :  { %2164 = vrot.lane.b32.xlu0 %v3818_v15, %s4027_s2 }
0x18c9   :  { %v2165_v18 = vpop.permute.xlu0 %2164 }
0x18ca   :  { %v2167_v19 = vmul.f32 %v3816_v21, %v2165_v18 }
0x18cc   :  { %v2169_v22 = vrot.slane %v2167_v19, 6 }
0x18ce   :  { %2170 = vrot.lane.b32.xlu1 %v2169_v22, %s4028_s19 }
0x1940   :  { %v2171_v24 = vpop.permute.xlu1 %2170 }
0x1941   :  { %3419 = vmatmul.mubr.msk.f32.vlgmr.msra.gmra.mrb[22].mxu0 %vm218_vm2, %v2171_v24 }
0x1942   :  { %3634 = vmatpush3.bf16.msra.mxu0 %v4509_v26  ;;  %3440 = vmatprep.mubr.msk.f32.mxu0 %vm4026_vm0, %v4025_v1 }
0x1943   :  { %3635 = vmatprep.subr.bf16.mxu0 %v4024_v0 }
0x1946   :  { %3637 = vmatpush3.bf16.msra.mxu0 %v4519_v33 }
0x1947   :  { %3644 = vmatprep.subr.bf16.mxu0 %v4024_v0 }
0x1a14   :  { %v2240_v55 = vpop.f32.mrb[22].mxu0 }
0x1a15   :  { %v2245_v23 = vrot.slane %v2240_v55, 4  ;;  %v3420_v42 = vpop.f32.mrb[23].mxu0 }
0x1a17   :  { %v2247_v5 = vadd.f32 %v2245_v23, %v4556_v30 }
0x1a19   :  { %3819 = vtanh.f32 %v2247_v5  ;;  %v3054_v37 = vmul.f32 -1.442695, %v2247_v5 }
0x1a1b   :  { %3821 = vpow2.f32 %v3054_v37 }
0x1a23   :  { %v3820_v52 = vpop.eup %3819 }
0x1a24   :  { %2260 = vrot.lane.b32.xlu0 %v3820_v52, %s4027_s2 }
0x1a25   :  { %v3822_v20 = vpop.eup %3821 }
0x1a26   :  { %v2251_v3 = vadd.f32 1.0, %v3822_v20 }
0x1a28   :  { %3823 = vrcp.f32 %v2251_v3 }
0x1a32   :  { %v3824_v57 = vpop.eup %3823 }
0x1a33   :  { %v2258_v28 = vmul.f32 %v3824_v57, %v2256_v27 }
0x1a96   :  { %v2261_v39 = vpop.permute.xlu0 %2260 }
0x1a97   :  { %v2263_v25 = vmul.f32 %v3824_v57, %v2261_v39 }
0x1a99   :  { %2265 = vrot.lane.b32.xlu1 %v2263_v25, %s4028_s19 }
0x1b0b   :  { %v2266_v29 = vpop.permute.xlu1 %2265 }
0x1b0c   :  { %v2268_v31 = vadd.f32 %v2266_v29, %v2258_v28 }
0x1b0e   :  { %3825 = vtanh.f32 %v2268_v31  ;;  %v2363_v56 = vrot.slane %v2268_v31, 2 }
0x1b18   :  { %v3826_v32 = vpop.eup %3825 }
0x1b19   :  { %2271 = vrot.lane.b32.xlu0 %v3826_v32, %s4027_s2 }
0x1b8b   :  { %v2272_v35 = vpop.permute.xlu0 %2271 }
0x1b8c   :  { %v2274_v36 = vmul.f32 %v3824_v57, %v2272_v35 }
0x1b8e   :  { %v2276_v40 = vrot.slane %v2274_v36, 4 }
0x1b90   :  { %2277 = vrot.lane.b32.xlu1 %v2276_v40, %s4028_s19 }
0x1c02   :  { %v2278_v41 = vpop.permute.xlu1 %2277 }
0x1c03   :  { %3430 = vmatmul.mubr.msk.f32.vlgmr.msra.gmra.mrb[18].mxu1 %vm218_vm2, %v2278_v41 }
0x1c04   :  { %3640 = vmatpush3.bf16.msra.mxu1 %v4509_v26  ;;  %3451 = vmatprep.mubr.msk.f32.mxu1 %vm4026_vm0, %v4025_v1 }
0x1c05   :  { %3641 = vmatprep.subr.bf16.mxu1 %v4024_v0 }
0x1c08   :  { %3643 = vmatpush3.bf16.msra.mxu1 %v4519_v33 }
0x1c09   :  { %3650 = vmatprep.subr.bf16.mxu1 %v4024_v0 }
0x1cd6   :  { %v2347_v43 = vpop.f32.mrb[18].mxu1 }
0x1cd7   :  { %v2352_v44 = vrot.slane %v2347_v43, 6  ;;  %v3431_v45 = vpop.f32.mrb[19].mxu1 }
0x1cd9   :  { %v2354_v46 = vadd.f32 %v2352_v44, %v4556_v30 }
0x1cdb   :  { %3827 = vtanh.f32 %v2354_v46  ;;  %v3056_v47 = vmul.f32 -1.442695, %v2354_v46 }
0x1cdd   :  { %3829 = vpow2.f32 %v3056_v47 }
0x1ce5   :  { %v3828_v48 = vpop.eup %3827 }
0x1ce6   :  { %2367 = vrot.lane.b32.xlu0 %v3828_v48, %s4027_s2 }
0x1ce7   :  { %v3830_v49 = vpop.eup %3829 }
0x1ce8   :  { %v2358_v50 = vadd.f32 1.0, %v3830_v49 }
0x1cea   :  { %3831 = vrcp.f32 %v2358_v50 }
0x1cf4   :  { %v3832_v51 = vpop.eup %3831 }
0x1cf5   :  { %v2365_v58 = vmul.f32 %v3832_v51, %v2363_v56 }
0x1d58   :  { %v2368_v53 = vpop.permute.xlu0 %2367 }
0x1d59   :  { %v2370_v54 = vmul.f32 %v3832_v51, %v2368_v53 }
0x1d5b   :  { %2372 = vrot.lane.b32.xlu1 %v2370_v54, %s4028_s19 }
0x1dcd   :  { %v2373_v59 = vpop.permute.xlu1 %2372 }
0x1dce   :  { %v2375_v10 = vadd.f32 %v2373_v59, %v2365_v58 }
0x1dd0   :  { %3833 = vtanh.f32 %v2375_v10  ;;  %v2467_v12 = vrot.slane %v2375_v10, 2 }
0x1dda   :  { %v3834_v60 = vpop.eup %3833 }
0x1ddb   :  { %2378 = vrot.lane.b32.xlu0 %v3834_v60, %s4027_s2 }
0x1e4d   :  { %v2379_v61 = vpop.permute.xlu0 %2378 }
0x1e4e   :  { %v2381_v62 = vmul.f32 %v3832_v51, %v2379_v61 }
0x1e50   :  { %v2383_v17 = vrot.slane %v2381_v62, 2 }
0x1e52   :  { %2384 = vrot.lane.b32.xlu1 %v2383_v17, %s4028_s19 }
0x1ec4   :  { %v2385_v63 = vpop.permute.xlu1 %2384 }
0x1ec5   :  { %3441 = vmatmul.mubr.msk.f32.vlgmr.msra.gmra.mrb[24].mxu0 %vm218_vm2, %v2385_v63 }
0x1ec6   :  { %3646 = vmatpush3.bf16.msra.mxu0 %v4509_v26  ;;  %3462 = vmatprep.mubr.msk.f32.mxu0 %vm4026_vm0, %v4025_v1 }
0x1ec7   :  { %3647 = vmatprep.subr.bf16.mxu0 %v4024_v0 }
0x1eca   :  { %3649 = vmatpush3.bf16.msra.mxu0 %v4519_v33 }
0x1ecb   :  { %3656 = vmatprep.subr.bf16.mxu0 %v4024_v0 }
0x1f98   :  { %v2454_v38 = vpop.f32.mrb[24].mxu0 }
0x1f99   :  { %v2458_v2 = vadd.f32 %v2454_v38, %v4556_v30  ;;  %v3442_v6 = vpop.f32.mrb[25].mxu0 }
0x1f9b   :  { %3835 = vtanh.f32 %v2458_v2  ;;  %v3058_v7 = vmul.f32 -1.442695, %v2458_v2 }
0x1f9d   :  { %3837 = vpow2.f32 %v3058_v7 }
0x1fa5   :  { %v3836_v34 = vpop.eup %3835 }
0x1fa6   :  { %2471 = vrot.lane.b32.xlu0 %v3836_v34, %s4027_s2 }
0x1fa7   :  { %v3838_v9 = vpop.eup %3837 }
0x1fa8   :  { %v2462_v8 = vadd.f32 1.0, %v3838_v9 }
0x1faa   :  { %3839 = vrcp.f32 %v2462_v8 }
0x1fb4   :  { %v3840_v21 = vpop.eup %3839 }
0x1fb5   :  { %v2469_v13 = vmul.f32 %v3840_v21, %v2467_v12 }
0x2018   :  { %v2472_v11 = vpop.permute.xlu0 %2471 }
0x2019   :  { %v2474_v16 = vmul.f32 %v3840_v21, %v2472_v11 }
0x201b   :  { %2476 = vrot.lane.b32.xlu1 %v2474_v16, %s4028_s19 }
0x208d   :  { %v2477_v14 = vpop.permute.xlu1 %2476 }
0x208e   :  { %v2479_v15 = vadd.f32 %v2477_v14, %v2469_v13 }
0x2090   :  { %3841 = vtanh.f32 %v2479_v15  ;;  %v2573_v25 = vrot.slane %v2479_v15, 2 }
0x209a   :  { %v3842_v30 = vpop.eup %3841 }
0x209b   :  { %2482 = vrot.lane.b32.xlu0 %v3842_v30, %s4027_s2 }
0x210d   :  { %v2483_v18 = vpop.permute.xlu0 %2482 }
0x210e   :  { %v2485_v19 = vmul.f32 %v3840_v21, %v2483_v18 }
0x2110   :  { %2487 = vrot.lane.b32.xlu1 %v2485_v19, %s4028_s19 }
0x2182   :  { %v2488_v22 = vpop.permute.xlu1 %2487 }
0x2183   :  { %3452 = vmatmul.mubr.msk.f32.vlgmr.msra.gmra.mrb[20].mxu1 %vm218_vm2, %v2488_v22 }
0x2184   :  { %3652 = vmatpush3.bf16.msra.mxu1 %v4509_v26  ;;  %3473 = vmatprep.mubr.msk.f32.mxu1 %vm4026_vm0, %v4025_v1 }
0x2185   :  { %3653 = vmatprep.subr.bf16.mxu1 %v4024_v0 }
0x2188   :  { %3655 = vmatpush3.bf16.msra.mxu1 %v4519_v33 }
0x2189   :  { %3662 = vmatprep.subr.bf16.mxu1 %v4024_v0 }
0x2256   :  { %v2557_v24 = vpop.f32.mrb[20].mxu1 }
0x2257   :  { %v2562_v55 = vrot.slane %v2557_v24, 2  ;;  %v3453_v23 = vpop.f32.mrb[21].mxu1 }
0x2259   :  { %v2564_v42 = vadd.f32 %v2562_v55, %v4558_v4 }
0x225b   :  { %3843 = vtanh.f32 %v2564_v42  ;;  %v3060_v52 = vmul.f32 -1.442695, %v2564_v42 }
0x225d   :  { %3845 = vpow2.f32 %v3060_v52 }
0x2265   :  { %v3844_v5 = vpop.eup %3843 }
0x2266   :  { %2577 = vrot.lane.b32.xlu0 %v3844_v5, %s4027_s2 }
0x2267   :  { %v3846_v37 = vpop.eup %3845 }
0x2268   :  { %v2568_v20 = vadd.f32 1.0, %v3846_v37 }
0x226a   :  { %3847 = vrcp.f32 %v2568_v20 }
0x2274   :  { %v3848_v3 = vpop.eup %3847 }
0x2275   :  { %v2575_v27 = vmul.f32 %v3848_v3, %v2573_v25 }
0x22d8   :  { %v2578_v57 = vpop.permute.xlu0 %2577 }
0x22d9   :  { %v2580_v39 = vmul.f32 %v3848_v3, %v2578_v57 }
0x22db   :  { %2582 = vrot.lane.b32.xlu1 %v2580_v39, %s4028_s19 }
0x234d   :  { %v2583_v28 = vpop.permute.xlu1 %2582 }
0x234e   :  { %v2585_v29 = vadd.f32 %v2583_v28, %v2575_v27  ;;  %v2912_v27 = vld [vmem:[%s4675_s8 + $0x8] sm:$0xff]  ;;  %v2913_v28 = vld [vmem:[%s4675_s8 + $0x10] sm:$0xff] }
0x2350   :  { %3849 = vtanh.f32 %v2585_v29 }
0x235a   :  { %v3850_v31 = vpop.eup %3849 }
0x235b   :  { %2588 = vrot.lane.b32.xlu0 %v3850_v31, %s4027_s2  ;;  %v2914_v31 = vld [vmem:[%s4675_s8 + $0x18] sm:$0xff] }
0x23cd   :  { %v2589_v32 = vpop.permute.xlu0 %2588 }
0x23ce   :  { %v2591_v35 = vmul.f32 %v3848_v3, %v2589_v32  ;;  %v3666_v32 = vpack.c.bf16 %v2914_v31, %v2913_v28 }
0x23d0   :  { %v2593_v36 = vrot.slane %v2591_v35, 6 }
0x23d2   :  { %2594 = vrot.lane.b32.xlu1 %v2593_v36, %s4028_s19 }
0x2444   :  { %v2595_v40 = vpop.permute.xlu1 %2594 }
0x2445   :  { %3463 = vmatmul.mubr.msk.f32.vlgmr.msra.gmra.mrb[26].mxu0 %vm218_vm2, %v2595_v40 }
0x2446   :  { %3658 = vmatpush3.bf16.msra.mxu0 %v4509_v26  ;;  %3484 = vmatprep.mubr.msk.f32.mxu0 %vm4026_vm0, %v4025_v1 }
0x2447   :  { %3659 = vmatprep.subr.bf16.mxu0 %v4024_v0 }
0x244a   :  { %3661 = vmatpush3.bf16.msra.mxu0 %v4519_v33  ;;  %v2680_v33 = vrot.slane %v2585_v29, 2 }
0x2518   :  { %v2664_v41 = vpop.f32.mrb[26].mxu0 }
0x2519   :  { %v2669_v43 = vrot.slane %v2664_v41, 4  ;;  %v3464_v44 = vpop.f32.mrb[27].mxu0 }
0x251a   :  { %v3067_v44 = vld [vmem:[%s4676_s9] ss:$0 sm:$0xff] }
0x251b   :  { %v2671_v45 = vadd.f32 %v2669_v43, %v4558_v4 }
0x251d   :  { %3851 = vtanh.f32 %v2671_v45  ;;  %v3062_v48 = vmul.f32 -1.442695, %v2671_v45 }
0x251f   :  { %3853 = vpow2.f32 %v3062_v48 }
0x2527   :  { %v3852_v46 = vpop.eup %3851 }
0x2528   :  { %2684 = vrot.lane.b32.xlu0 %v3852_v46, %s4027_s2 }
0x2529   :  { %v3854_v47 = vpop.eup %3853 }
0x252a   :  { %v2675_v26 = vadd.f32 1.0, %v3854_v47 }
0x252c   :  { %3855 = vrcp.f32 %v2675_v26 }
0x2536   :  { %v3856_v49 = vpop.eup %3855 }
0x2537   :  { %v2682_v53 = vmul.f32 %v3856_v49, %v2680_v33 }
0x259a   :  { %v2685_v50 = vpop.permute.xlu0 %2684 }
0x259b   :  { %v2687_v51 = vmul.f32 %v3856_v49, %v2685_v50 }
0x259d   :  { %2689 = vrot.lane.b32.xlu1 %v2687_v51, %s4028_s19 }
0x260f   :  { %v2690_v54 = vpop.permute.xlu1 %2689 }
0x2610   :  { %v2692_v56 = vadd.f32 %v2690_v54, %v2682_v53 }
0x2612   :  { %3857 = vtanh.f32 %v2692_v56 }
0x261c   :  { %v3858_v58 = vpop.eup %3857 }
0x261d   :  { %2695 = vrot.lane.b32.xlu0 %v3858_v58, %s4027_s2 }
0x268f   :  { %v2696_v59 = vpop.permute.xlu0 %2695 }
0x2690   :  { %v2698_v10 = vmul.f32 %v3856_v49, %v2696_v59 }
0x2692   :  { %v2700_v60 = vrot.slane %v2698_v10, 4 }
0x2694   :  { %2701 = vrot.lane.b32.xlu1 %v2700_v60, %s4028_s19 }
0x2706   :  { %v2702_v61 = vpop.permute.xlu1 %2701 }
0x2707   :  { %3474 = vmatmul.mubr.msk.f32.vlgmr.msra.gmra.mrb[22].mxu1 %vm218_vm2, %v2702_v61 }
0x2708   :  { %3495 = vmatprep.mubr.msk.f32.mxu1 %vm4026_vm0, %v4025_v1  ;;  %v2787_v1 = vrot.slane %v2692_v56, 2 }
0x27da   :  { %v2771_v62 = vpop.f32.mrb[22].mxu1 }
0x27db   :  { %v2776_v17 = vrot.slane %v2771_v62, 6  ;;  %v3475_v63 = vpop.f32.mrb[23].mxu1 }
0x27dd   :  { %v2778_v38 = vadd.f32 %v2776_v17, %v4558_v4 }
0x27df   :  { %3859 = vtanh.f32 %v2778_v38  ;;  %v3064_v6 = vmul.f32 -1.442695, %v2778_v38 }
0x27e1   :  { %3861 = vpow2.f32 %v3064_v6 }
0x27e9   :  { %v3860_v2 = vpop.eup %3859 }
0x27ea   :  { %2791 = vrot.lane.b32.xlu0 %v3860_v2, %s4027_s2 }
0x27eb   :  { %v3862_v34 = vpop.eup %3861 }
0x27ec   :  { %v2782_v7 = vadd.f32 1.0, %v3862_v34 }
0x27ee   :  { %3863 = vrcp.f32 %v2782_v7 }
0x27f8   :  { %v3864_v9 = vpop.eup %3863 }
0x27f9   :  { %v2789_v11 = vmul.f32 %v3864_v9, %v2787_v1 }
0x285c   :  { %v2792_v8 = vpop.permute.xlu0 %2791 }
0x285d   :  { %v2794_v21 = vmul.f32 %v3864_v9, %v2792_v8 }
0x285f   :  { %2796 = vrot.lane.b32.xlu1 %v2794_v21, %s4028_s19 }
0x28d1   :  { %v2797_v16 = vpop.permute.xlu1 %2796 }
0x28d2   :  { %v2799_v12 = vadd.f32 %v2797_v16, %v2789_v11 }
0x28d4   :  { %3865 = vtanh.f32 %v2799_v12  ;;  %v2891_v3 = vrot.slane %v2799_v12, 2 }
0x28de   :  { %v3866_v13 = vpop.eup %3865 }
0x28df   :  { %2802 = vrot.lane.b32.xlu0 %v3866_v13, %s4027_s2 }
0x2951   :  { %v2803_v14 = vpop.permute.xlu0 %2802 }
0x2952   :  { %v2805_v15 = vmul.f32 %v3864_v9, %v2803_v14 }
0x2954   :  { %v2807_v30 = vrot.slane %v2805_v15, 2 }
0x2956   :  { %2808 = vrot.lane.b32.xlu1 %v2807_v30, %s4028_s19 }
0x29c8   :  { %v2809_v18 = vpop.permute.xlu1 %2808 }
0x29c9   :  { %3485 = vmatmul.mubr.msk.f32.vlgmr.msra.gmra.mrb[28].mxu0 %vm218_vm2, %v2809_v18 }
0x2a9c   :  { %v2878_v19 = vpop.f32.mrb[28].mxu0 }
0x2a9d   :  { %v2882_v22 = vadd.f32 %v2878_v19, %v4558_v4  ;;  %v3486_v24 = vpop.f32.mrb[29].mxu0  ;;  %v2911_v4 = vld [vmem:[%s4675_s8] sm:$0xff]  ;;  %s4029_s8 = smov [#allocation12]  }
0x2a9e   :  { %v3663_v29 = vpack.c.bf16 %v2912_v27, %v2911_v4  ;;  %s3006_s17 = sshll.u32 %s4029_s8, 4  ;;  %s3007_s17 = int_to_ptr.vmem [resolvable:$true] %s3006_s17 }
0x2a9f   :  { %3867 = vtanh.f32 %v2882_v22  ;;  %v3066_v23 = vmul.f32 -1.442695, %v2882_v22  ;;  %p3990_p13 = scmp.lt.s32.totalorder %s3007_s17, %s3007_s17 }
0x2aa0   :  { %3664 = vmatpush3.bf16.msra.mxu1 %v3663_v29 }
0x2aa1   :  { %3869 = vpow2.f32 %v3066_v23  ;;  %3665 = vmatprep.subr.bf16.mxu1 %v4024_v0 }
0x2aa4   :  { %3667 = vmatpush3.bf16.msra.mxu1 %v3666_v32 }
0x2aa9   :  { %v3868_v55 = vpop.eup %3867 }
0x2aaa   :  { %2895 = vrot.lane.b32.xlu0 %v3868_v55, %s4027_s2 }
0x2aab   :  { %v3870_v42 = vpop.eup %3869 }
0x2aac   :  { %v2886_v5 = vadd.f32 1.0, %v3870_v42 }
0x2aae   :  { %3871 = vrcp.f32 %v2886_v5 }
0x2ab8   :  { %v3872_v52 = vpop.eup %3871 }
0x2ab9   :  { %v2893_v57 = vmul.f32 %v3872_v52, %v2891_v3 }
0x2b1c   :  { %v2896_v37 = vpop.permute.xlu0 %2895 }
0x2b1d   :  { %v2898_v20 = vmul.f32 %v3872_v52, %v2896_v37 }
0x2b1f   :  { %2900 = vrot.lane.b32.xlu1 %v2898_v20, %s4028_s19 }
0x2b91   :  { %v2901_v39 = vpop.permute.xlu1 %2900 }
0x2b92   :  { %v2903_v25 = vadd.f32 %v2901_v39, %v2893_v57 }
0x2b94   :  { %3873 = vtanh.f32 %v2903_v25 }
0x2b9e   :  { %v3874_v35 = vpop.eup %3873 }
0x2b9f   :  { %2906 = vrot.lane.b32.xlu0 %v3874_v35, %s4027_s2  ;;  %s3985_s2 = scalar_lea.vmem %s3007_s17, 32 }
0x2ba0   :  { %p3986_p12 = scmp.ne.s32.totalorder %s3007_s17, %s3985_s2  ;;  %p3991_p0 = scmp.lt.s32.totalorder %s3985_s2, %s3985_s2 }
0x2ba2   :  { %p3992_p1 = por %p3991_p0, %p3990_p13 }
0x2ba4   :  { %p3993_p2 = pnand %p3992_p1, %p3986_p12 }
0x2c11   :  { %v2907_v36 = vpop.permute.xlu0 %2906 }
0x2c12   :  { %v2909_v40 = vmul.f32 %v3872_v52, %v2907_v36 }
0x2c14   :  { %v2910_v41 = vmax.f32 %v2909_v40, 0.0 }
0x2c16   :  { %2923 = vrot.lane.b32.xlu1 %v2910_v41, %s4028_s19 }
0x2c88   :  { %v2924_v43 = vpop.permute.xlu1 %2923 }
0x2c89   :  { %3496 = vmatmul.mubr.msk.f32.vlgmr.msra.gmra.mrb[24].mxu1 %vm218_vm2, %v2924_v43 }
0x2d5c   :  { %v2993_v45 = vpop.f32.mrb[24].mxu1 }
0x2d5d   :  { %v2994_v0 = vadd.f32 %v3067_v44, %v2993_v45  ;;  %v3497_v46 = vpop.f32.mrb[25].mxu1 }
0x2d5f   :  { %v2997_v48 = vmax.f32 %v2994_v0, 0.0 }
0x2d61   :  { %2999 = vst.msk [vmem:[#allocation12] sm:$0x3] %vm2998_vm12, %v2997_v48 }
0x2d62   :  { %3996 = shalt.err (!%p3993_p2)
}
0x2d63   :  { %s3997_s9 = scalar_lea.hbm %s4677_s10, 32 }
0x2d64   :  { %p3998_p3 = scmp.ne.s32.totalorder %s4677_s10, %s3997_s9  ;;  %p4001_p4 = scmp.lt.u32.totalorder %s3997_s9, %s4677_s10 }
0x2d66   :  { %p4003_p5 = pnand %p4001_p4, %p3998_p3 }
0x2d68   :  { %4006 = shalt.err (!%p4003_p5)
}
0x2d69   :  { %3009 = dma.vmem_to_hbm [thread:$0]  %s3007_s17, 32, %s4677_s10, [#allocation5]  }
0x2d6a   :  { %4013 = dma.done.wait [#allocation5], 32  }
0x2d6b   :  { %4014 = vsyncadd [#allocation5], 4294967264 }
0x2d6c   :  { %3013 = vsyncpa [#allocation4], 1 }
0x2d6d   :  { %3014 = vsyncpa [#allocation7], 1 }
0x2d6e   :  { %3015 = vsyncpa [#allocation10], 1 }
0x2d6f   :  { %3016 = vsyncpa [#allocation5], 1 }

</bundles_post_ra>
